<compile_context>
chip_gen: v7x
topology: tpu7x:2x2x1
jax: 0.10.0
libtpu: 0.0.40
codegen_flags: <defaults>
</compile_context>

<pallas_src>
import math

import jax
import jax.numpy as jnp
from jax.experimental import pallas as pl
from jax.experimental.pallas import tpu as pltpu


# ----------------------------- Pallas kernel --------------------------------

def make_kernel(num_layers, T, B, D, H, mm_dtype, max_unroll):
    """Build the single-invocation bidirectional-LSTM kernel.

    Kernel refs (in order):
      x_ref                          (T, B, D)   time-major input (f32), VMEM resident
      [wx_l, wh_l, b_l] * L          (D_in,4H) mm_dtype, (H,4H) mm_dtype, (1,4H) f32 (bx+bh)
      wfc_f_ref, wfc_b_ref           (H, O_pad) mm_dtype   forward / backward fc halves
      bfc_ref                        (1, O_pad) f32
      out_ref                        (B, O_pad) f32
      xp_ref (scratch)               (T, B, 4H) f32        precomputed layer-0 x-projection
    """

    def kernel(*refs):
        x_ref = refs[0]
        layer_refs = refs[1:1 + 3 * num_layers]
        wfc_f_ref = refs[1 + 3 * num_layers]
        wfc_b_ref = refs[2 + 3 * num_layers]
        bfc_ref = refs[3 + 3 * num_layers]
        out_ref = refs[4 + 3 * num_layers]
        xp_ref = refs[5 + 3 * num_layers]

        # ---- hoisted weight / bias loads: read ONCE, stay vreg/VMEM resident for the
        #      whole recurrence (no per-(t, l) reloads, no per-step bias broadcasts). ----
        wx = [layer_refs[3 * l][...] for l in range(num_layers)]        # (D_in, 4H)
        wh = [layer_refs[3 * l + 1][...] for l in range(num_layers)]    # (H, 4H)
        bias = [layer_refs[3 * l + 2][...] for l in range(num_layers)]  # (1, 4H) f32
        # layer-0 bias is folded into the precomputed projection; hoist the others' broadcast
        bias_b = [None] + [jnp.broadcast_to(bias[l], (B, 4 * H))
                           for l in range(1, num_layers)]

        def mm(a, w):
            # MXU matmul with (optionally bf16) operands and f32 accumulation.
            return jnp.dot(a.astype(mm_dtype), w, preferred_element_type=jnp.float32)

        # Gate order matches the module's torch.tensor_split: [f, i, g(tanh), o].
        # sigmoid/tanh are computed FULL-WIDTH on (M, 4H) (2 EUP pushes per step instead
        # of 4) and then sliced.  NOTE(layout): with H=32 the lane-offset slices still cost
        # XLU rotations; if H is ever scaled up, keep the per-gate stride a multiple of 128.
        def gates(z, c):
            s = jax.nn.sigmoid(z)
            th = jnp.tanh(z)
            f = s[:, 0:H]
            i = s[:, H:2 * H]
            g = th[:, 2 * H:3 * H]
            o = s[:, 3 * H:4 * H]
            c_new = f * c + i * g
            return o * jnp.tanh(c_new), c_new

        def gates_zero_state(z):          # c == 0  ->  skip the f*c term
            s = jax.nn.sigmoid(z)
            th = jnp.tanh(z)
            i = s[:, H:2 * H]
            g = th[:, 2 * H:3 * H]
            o = s[:, 3 * H:4 * H]
            c_new = i * g
            return o * jnp.tanh(c_new), c_new

        # ---- layer-0 input projection (+bias) for ALL timesteps: one big MXU call,
        #      pulled OFF the serial dependency chain. ----
        xp_ref[...] = (mm(x_ref[...].reshape(T * B, D), wx[0])
                       + bias[0]).reshape(T, B, 4 * H)

        # ---- t == 0: forward step on x[0] and backward FIRST step on x[T-1] (the only
        #      backward step the module output uses), stacked along the batch axis.
        #      Both start from zero (h, c), so every h@Wh term vanishes here. ----
        z0 = jnp.concatenate([xp_ref[0], xp_ref[T - 1]], axis=0)       # (2B, 4H)
        cur2, c2 = gates_zero_state(z0)
        hs = [cur2[:B]]                     # forward per-layer hidden state at t = 0
        cs = [c2[:B]]                       # forward per-layer cell   state at t = 0
        for l in range(1, num_layers):
            zl = mm(cur2, wx[l]) + bias[l]  # h == 0  ->  no recurrent dot
            cur2, c2 = gates_zero_state(zl)
            hs.append(cur2[:B])
            cs.append(c2[:B])
        hb = cur2[B:]                       # backward top-layer hidden (== outs_rev[0])

        # Backward half of fc (+ fc bias) computed NOW, hidden behind the forward recurrence.
        fc_acc = mm(hb, wfc_b_ref[...]) + bfc_ref[...]                  # (B, O_pad) f32

        # ---- forward recurrence, t = 1 .. T-1 ----
        def one_step(xz, hs_in, cs_in):
            # layer 0: only the recurrent dot (input projection precomputed, K = H)
            h0, c0 = gates(xz + mm(hs_in[0], wh[0]), cs_in[0])
            new_h, new_c = [h0], [c0]
            cur = h0
            for l in range(1, num_layers):
                # two dots instead of concat-then-dot: no per-step lane concat
                zl = mm(cur, wx[l]) + mm(hs_in[l], wh[l]) + bias_b[l]
                hl, cl = gates(zl, cs_in[l])
                new_h.append(hl)
                new_c.append(cl)
                cur = hl
            return new_h, new_c

        if T - 1 <= max_unroll:
            # Small T: full static unroll (T is a compile-time constant).
            for t in range(1, T):
                hs, cs = one_step(xp_ref[t], hs, cs)
            h_top = hs[num_layers - 1]
        else:
            # Large T: bounded-unroll fori_loop caps program size / vreg live ranges
            # while keeping LLO scheduling visibility (weights already hoisted above).
            def body(t, carry):
                h_st, c_st = carry
                nh, nc = one_step(xp_ref[t],
                                  [h_st[l] for l in range(num_layers)],
                                  [c_st[l] for l in range(num_layers)])
                return jnp.stack(nh), jnp.stack(nc)

            h_st, _ = jax.lax.fori_loop(1, T, body,
                                        (jnp.stack(hs), jnp.stack(cs)), unroll=4)
            h_top = h_st[num_layers - 1]

        # ---- epilogue: forward half of fc + precomputed backward half; one unmasked,
        #      lane-dense (B, O_pad) store. ----
        out_ref[...] = mm(h_top, wfc_f_ref[...]) + fc_acc

    return kernel


def bidir_lstm_forward(x_btd, params, num_layers, hidden_size, output_size,
                       matmul_dtype=jnp.bfloat16, max_unroll=16):
    """Batch-first (B, T, D) -> (B, O), matching BidirRecurrentModel(mode='LSTM').

    matmul_dtype: dtype of the MXU operands (accumulation is always f32).
      bfloat16 (default) roughly triples MXU throughput per dependent step;
      pass jnp.float32 for tight numerical parity with the f32 reference.
    """
    B, T, D = x_btd.shape
    H = hidden_size
    O = output_size
    x_tbd = jnp.transpose(x_btd, (1, 0, 2))            # time-major (T, B, D)

    inputs = [x_tbd]
    for l in range(num_layers):
        wx_t, wh_t, bx, bh = params["layers"][l]
        inputs.append(wx_t.astype(matmul_dtype))       # (D_in, 4H)
        inputs.append(wh_t.astype(matmul_dtype))       # (H, 4H)
        inputs.append(bx + bh)                         # (1, 4H) fused bias, f32

    # fc weight split into forward/backward halves (removes the final lane concat) and
    # lane-padded to a multiple of 128 so the single output store is unmasked.
    wfc_t, bfc = params["fc"]                          # (2H, O), (1, O)
    o_pad = max(128, ((O + 127) // 128) * 128)
    wfc_pad = jnp.zeros((2 * H, o_pad), jnp.float32).at[:, :O].set(wfc_t)
    bfc_pad = jnp.zeros((1, o_pad), jnp.float32).at[:, :O].set(bfc)
    inputs += [wfc_pad[:H].astype(matmul_dtype),       # forward half
               wfc_pad[H:].astype(matmul_dtype),       # backward half
               bfc_pad]

    # Single invocation, no grid: total resident footprint (input + weights + fc) is far
    # below the scoped-VMEM limit on v5e/v6e/v7x, so every operand lives whole in VMEM.
    # TODO(synk): if B is scaled up on v7x, add a leading batch-tile grid axis with
    # dimension_semantics=("parallel",) so both TensorCores are used.
    vmem = pltpu.MemorySpace.VMEM
    in_specs = [pl.BlockSpec(memory_space=vmem) for _ in inputs]

    out_padded = pl.pallas_call(
        make_kernel(num_layers, T, B, D, H, matmul_dtype, max_unroll),
        out_shape=jax.ShapeDtypeStruct((B, o_pad), jnp.float32),
        in_specs=in_specs,
        out_specs=pl.BlockSpec(memory_space=vmem),
        scratch_shapes=[pltpu.VMEM((T, B, 4 * H), jnp.float32)],
    )(*inputs)
    return out_padded[:, :O]


# ------------------------ parameter init & reference ------------------------

def init_params(key, input_size, hidden_size, num_layers, output_size):
    """Deterministic init matching the PyTorch module's shapes (uniform(-std, std))."""
    H = hidden_size
    std = 1.0 / math.sqrt(H)
    layers = []
    for l in range(num_layers):
        d_in = input_size if l == 0 else H
        key, k0, k1, k2, k3 = jax.random.split(key, 5)
        wx = jax.random.uniform(k0, (4 * H, d_in), jnp.float32, -std, std)
        wh = jax.random.uniform(k1, (4 * H, H), jnp.float32, -std, std)
        bx = jax.random.uniform(k2, (4 * H,), jnp.float32, -std, std)
        bh = jax.random.uniform(k3, (4 * H,), jnp.float32, -std, std)
        # stored transposed so the kernel does x @ W^T directly (no in-kernel transpose)
        layers.append((wx.T, wh.T, bx.reshape(1, -1), bh.reshape(1, -1)))
    fstd = 1.0 / math.sqrt(2 * H)
    key, kf0, kf1 = jax.random.split(key, 3)
    wfc = jax.random.uniform(kf0, (output_size, 2 * H), jnp.float32, -fstd, fstd)
    bfc = jax.random.uniform(kf1, (output_size,), jnp.float32, -fstd, fstd)
    return {"layers": layers, "fc": (wfc.T, bfc.reshape(1, -1))}


def reference_forward(x, params, num_layers, H):
    """Pure-JAX transcription of BidirRecurrentModel.forward (mode='LSTM')."""
    B, T, _ = x.shape

    def cell(xi, h, c, p):
        wx_t, wh_t, bx, bh = p
        z = xi @ wx_t + bx + h @ wh_t + bh
        f = jax.nn.sigmoid(z[:, :H])
        i = jax.nn.sigmoid(z[:, H:2 * H])
        g = jnp.tanh(z[:, 2 * H:3 * H])
        o = jax.nn.sigmoid(z[:, 3 * H:])
        c2 = f * c + i * g
        return o * jnp.tanh(c2), c2

    zeros = jnp.zeros((B, H), jnp.float32)
    hf = [(zeros, zeros) for _ in range(num_layers)]
    hb = [(zeros, zeros) for _ in range(num_layers)]
    outs, outs_rev = [], []
    for t in range(T):
        hf[0] = cell(x[:, t, :], hf[0][0], hf[0][1], params["layers"][0])
        hb[0] = cell(x[:, T - 1 - t, :], hb[0][0], hb[0][1], params["layers"][0])
        for l in range(1, num_layers):
            hf[l] = cell(hf[l - 1][0], hf[l][0], hf[l][1], params["layers"][l])
            hb[l] = cell(hb[l - 1][0], hb[l][0], hb[l][1], params["layers"][l])
        outs.append(hf[-1][0])
        outs_rev.append(hb[-1][0])
    cat = jnp.concatenate([outs[-1], outs_rev[0]], axis=1)
    wfc_t, bfc = params["fc"]
    return cat @ wfc_t + bfc


# ---------------------------------- main -------------------------------------

if __name__ == "__main__":
    B, T, D, H, L, O = 8, 8, 16, 32, 2, 16   # batch, seq, input, hidden, layers, output
    key = jax.random.PRNGKey(0)
    kx, kp = jax.random.split(key)
    x = jax.random.normal(kx, (B, T, D), jnp.float32)
    params = init_params(kp, D, H, L, O)

    # Default (bf16 MXU operands, f32 accumulation) and f32-operand parity variant.
    out_bf16 = jax.block_until_ready(bidir_lstm_forward(x, params, L, H, O))
    out_f32 = jax.block_until_ready(
        bidir_lstm_forward(x, params, L, H, O, matmul_dtype=jnp.float32))
    ref = reference_forward(x, params, L, H)

    assert out_bf16.shape == (B, O) and out_f32.shape == (B, O)
    # Tight parity check runs with f32 MXU operands.
    assert jnp.allclose(out_f32, ref, atol=1e-3, rtol=1e-3), \
        float(jnp.max(jnp.abs(out_f32 - ref)))
    # bf16 operand rounding (~2^-9 relative) accumulated over T steps -> looser bound.
    assert jnp.allclose(out_bf16, ref, atol=5e-2, rtol=5e-2), \
        float(jnp.max(jnp.abs(out_bf16 - ref)))

    # T == 1 edge case (t==0 block + epilogue only, no recurrence loop).
    out_t1 = jax.block_until_ready(
        bidir_lstm_forward(x[:, :1, :], params, L, H, O, matmul_dtype=jnp.float32))
    ref_t1 = reference_forward(x[:, :1, :], params, L, H)
    assert jnp.allclose(out_t1, ref_t1, atol=1e-3, rtol=1e-3), \
        float(jnp.max(jnp.abs(out_t1 - ref_t1)))

    # Long-sequence path: exercises the bounded-unroll fori_loop branch (T-1 > 16).
    T_long = 21
    x_long = jax.random.normal(jax.random.PRNGKey(1), (B, T_long, D), jnp.float32)
    out_long = jax.block_until_ready(
        bidir_lstm_forward(x_long, params, L, H, O, matmul_dtype=jnp.float32))
    ref_long = reference_forward(x_long, params, L, H)
    assert jnp.allclose(out_long, ref_long, atol=1e-3, rtol=1e-3), \
        float(jnp.max(jnp.abs(out_long - ref_long)))

    print("KERNEL_OK")
</pallas_src>

<mosaic_0001>
module attributes {stable_mosaic.version = 11 : i64} {
  func.func @kernel(%arg0: memref<8x8x16xf32, #tpu.memory_space<vmem>>, %arg1: memref<16x128xbf16, #tpu.memory_space<vmem>>, %arg2: memref<32x128xbf16, #tpu.memory_space<vmem>>, %arg3: memref<1x128xf32, #tpu.memory_space<vmem>>, %arg4: memref<32x128xbf16, #tpu.memory_space<vmem>>, %arg5: memref<32x128xbf16, #tpu.memory_space<vmem>>, %arg6: memref<1x128xf32, #tpu.memory_space<vmem>>, %arg7: memref<32x128xbf16, #tpu.memory_space<vmem>>, %arg8: memref<32x128xbf16, #tpu.memory_space<vmem>>, %arg9: memref<1x128xf32, #tpu.memory_space<vmem>>, %arg10: memref<8x128xf32, #tpu.memory_space<vmem>>, %arg11: memref<8x8x128xf32, #tpu.memory_space<vmem>>) attributes {dimension_semantics = [], scalar_prefetch = 0 : i64, scratch_operands = 1 : i64, tpu.core_type = #tpu.core_type<tc>} {
    %c0 = arith.constant 0 : index
    %c0_0 = arith.constant 0 : index
    %0 = vector.load %arg1[%c0, %c0_0] : memref<16x128xbf16, #tpu.memory_space<vmem>>, vector<16x128xbf16>
    %c0_1 = arith.constant 0 : index
    %c0_2 = arith.constant 0 : index
    %1 = vector.load %arg4[%c0_1, %c0_2] : memref<32x128xbf16, #tpu.memory_space<vmem>>, vector<32x128xbf16>
    %c0_3 = arith.constant 0 : index
    %c0_4 = arith.constant 0 : index
    %2 = vector.load %arg2[%c0_3, %c0_4] : memref<32x128xbf16, #tpu.memory_space<vmem>>, vector<32x128xbf16>
    %c0_5 = arith.constant 0 : index
    %c0_6 = arith.constant 0 : index
    %3 = vector.load %arg5[%c0_5, %c0_6] : memref<32x128xbf16, #tpu.memory_space<vmem>>, vector<32x128xbf16>
    %c0_7 = arith.constant 0 : index
    %c0_8 = arith.constant 0 : index
    %4 = vector.load %arg3[%c0_7, %c0_8] : memref<1x128xf32, #tpu.memory_space<vmem>>, vector<1x128xf32>
    %c0_9 = arith.constant 0 : index
    %c0_10 = arith.constant 0 : index
    %5 = vector.load %arg6[%c0_9, %c0_10] : memref<1x128xf32, #tpu.memory_space<vmem>>, vector<1x128xf32>
    %6 = vector.shape_cast %5 : vector<1x128xf32> to vector<1x128xf32>
    %7 = vector.broadcast %6 : vector<1x128xf32> to vector<8x128xf32>
    %c0_11 = arith.constant 0 : index
    %c0_12 = arith.constant 0 : index
    %c0_13 = arith.constant 0 : index
    %8 = vector.load %arg0[%c0_11, %c0_12, %c0_13] : memref<8x8x16xf32, #tpu.memory_space<vmem>>, vector<8x8x16xf32>
    %9 = vector.shape_cast %8 : vector<8x8x16xf32> to vector<64x16xf32>
    %10 = arith.truncf %9 : vector<64x16xf32> to vector<64x16xbf16>
    %cst = arith.constant dense<0.000000e+00> : vector<64x128xf32>
    %11 = tpu.matmul %10, %0, %cst {dimension_numbers = #tpu.dot_dimension_numbers<[1], [0], [0], [1], [0, 0, 1, 1], [], []>} : vector<64x16xbf16>, vector<16x128xbf16>, vector<64x128xf32> -> vector<64x128xf32>
    %12 = vector.broadcast %4 : vector<1x128xf32> to vector<64x128xf32>
    %13 = arith.addf %11, %12 : vector<64x128xf32>
    %14 = vector.shape_cast %13 : vector<64x128xf32> to vector<8x8x128xf32>
    %c0_14 = arith.constant 0 : index
    %c0_15 = arith.constant 0 : index
    %c0_16 = arith.constant 0 : index
    %15 = vector.load %arg11[%c0_14, %c0_15, %c0_16] : memref<8x8x128xf32, #tpu.memory_space<vmem>>, vector<8x8x128xf32>
    tpu.vector_store %arg11[%c0_14, %c0_15, %c0_16], %14 {strides = array<i32>} : memref<8x8x128xf32, #tpu.memory_space<vmem>>, vector<8x8x128xf32>,
    %c0_17 = arith.constant 0 : index
    %c0_18 = arith.constant 0 : index
    %c0_19 = arith.constant 0 : index
    %16 = vector.load %arg11[%c0_17, %c0_18, %c0_19] : memref<8x8x128xf32, #tpu.memory_space<vmem>>, vector<1x8x128xf32>
    %17 = vector.shape_cast %16 : vector<1x8x128xf32> to vector<8x128xf32>
    %c7 = arith.constant 7 : index
    %c0_20 = arith.constant 0 : index
    %c0_21 = arith.constant 0 : index
    %18 = vector.load %arg11[%c7, %c0_20, %c0_21] : memref<8x8x128xf32, #tpu.memory_space<vmem>>, vector<1x8x128xf32>
    %19 = vector.shape_cast %18 : vector<1x8x128xf32> to vector<8x128xf32>
    %20 = tpu.concatenate %17, %19 in 0 : vector<8x128xf32>, vector<8x128xf32> -> vector<16x128xf32>
    %21 = arith.negf %20 : vector<16x128xf32>
    %22 = math.exp %21 : vector<16x128xf32>
    %cst_22 = arith.constant 1.000000e+00 : f32
    %23 = vector.broadcast %cst_22 : f32 to vector<16x128xf32>
    %24 = arith.addf %23, %22 : vector<16x128xf32>
    %25 = arith.divf %23, %24 : vector<16x128xf32>
    %26 = math.tanh %20 : vector<16x128xf32>
    %27 = vector.extract_strided_slice %25 {offsets = [0, 32], sizes = [16, 32], strides = [1, 1]} : vector<16x128xf32> to vector<16x32xf32>
    %28 = vector.extract_strided_slice %26 {offsets = [0, 64], sizes = [16, 32], strides = [1, 1]} : vector<16x128xf32> to vector<16x32xf32>
    %29 = vector.extract_strided_slice %25 {offsets = [0, 96], sizes = [16, 32], strides = [1, 1]} : vector<16x128xf32> to vector<16x32xf32>
    %30 = arith.mulf %27, %28 : vector<16x32xf32>
    %31 = math.tanh %30 : vector<16x32xf32>
    %32 = arith.mulf %29, %31 : vector<16x32xf32>
    %33 = vector.extract_strided_slice %32 {offsets = [0, 0], sizes = [8, 32], strides = [1, 1]} : vector<16x32xf32> to vector<8x32xf32>
    %34 = vector.extract_strided_slice %30 {offsets = [0, 0], sizes = [8, 32], strides = [1, 1]} : vector<16x32xf32> to vector<8x32xf32>
    %35 = arith.truncf %32 : vector<16x32xf32> to vector<16x32xbf16>
    %cst_23 = arith.constant dense<0.000000e+00> : vector<16x128xf32>
    %36 = tpu.matmul %35, %1, %cst_23 {dimension_numbers = #tpu.dot_dimension_numbers<[1], [0], [0], [1], [0, 0, 1, 1], [], []>} : vector<16x32xbf16>, vector<32x128xbf16>, vector<16x128xf32> -> vector<16x128xf32>
    %37 = vector.broadcast %5 : vector<1x128xf32> to vector<16x128xf32>
    %38 = arith.addf %36, %37 : vector<16x128xf32>
    %39 = arith.negf %38 : vector<16x128xf32>
    %40 = math.exp %39 : vector<16x128xf32>
    %cst_24 = arith.constant 1.000000e+00 : f32
    %41 = vector.broadcast %cst_24 : f32 to vector<16x128xf32>
    %42 = arith.addf %41, %40 : vector<16x128xf32>
    %43 = arith.divf %41, %42 : vector<16x128xf32>
    %44 = math.tanh %38 : vector<16x128xf32>
    %45 = vector.extract_strided_slice %43 {offsets = [0, 32], sizes = [16, 32], strides = [1, 1]} : vector<16x128xf32> to vector<16x32xf32>
    %46 = vector.extract_strided_slice %44 {offsets = [0, 64], sizes = [16, 32], strides = [1, 1]} : vector<16x128xf32> to vector<16x32xf32>
    %47 = vector.extract_strided_slice %43 {offsets = [0, 96], sizes = [16, 32], strides = [1, 1]} : vector<16x128xf32> to vector<16x32xf32>
    %48 = arith.mulf %45, %46 : vector<16x32xf32>
    %49 = math.tanh %48 : vector<16x32xf32>
    %50 = arith.mulf %47, %49 : vector<16x32xf32>
    %51 = vector.extract_strided_slice %50 {offsets = [0, 0], sizes = [8, 32], strides = [1, 1]} : vector<16x32xf32> to vector<8x32xf32>
    %52 = vector.extract_strided_slice %48 {offsets = [0, 0], sizes = [8, 32], strides = [1, 1]} : vector<16x32xf32> to vector<8x32xf32>
    %53 = vector.extract_strided_slice %50 {offsets = [8, 0], sizes = [8, 32], strides = [1, 1]} : vector<16x32xf32> to vector<8x32xf32>
    %c0_25 = arith.constant 0 : index
    %c0_26 = arith.constant 0 : index
    %54 = vector.load %arg8[%c0_25, %c0_26] : memref<32x128xbf16, #tpu.memory_space<vmem>>, vector<32x128xbf16>
    %55 = arith.truncf %53 : vector<8x32xf32> to vector<8x32xbf16>
    %cst_27 = arith.constant dense<0.000000e+00> : vector<8x128xf32>
    %56 = tpu.matmul %55, %54, %cst_27 {dimension_numbers = #tpu.dot_dimension_numbers<[1], [0], [0], [1], [0, 0, 1, 1], [], []>} : vector<8x32xbf16>, vector<32x128xbf16>, vector<8x128xf32> -> vector<8x128xf32>
    %c0_28 = arith.constant 0 : index
    %c0_29 = arith.constant 0 : index
    %57 = vector.load %arg9[%c0_28, %c0_29] : memref<1x128xf32, #tpu.memory_space<vmem>>, vector<1x128xf32>
    %58 = vector.broadcast %57 : vector<1x128xf32> to vector<8x128xf32>
    %59 = arith.addf %56, %58 : vector<8x128xf32>
    %c1 = arith.constant 1 : index
    %c0_30 = arith.constant 0 : index
    %c0_31 = arith.constant 0 : index
    %60 = vector.load %arg11[%c1, %c0_30, %c0_31] : memref<8x8x128xf32, #tpu.memory_space<vmem>>, vector<1x8x128xf32>
    %61 = vector.shape_cast %60 : vector<1x8x128xf32> to vector<8x128xf32>
    %62 = arith.truncf %33 : vector<8x32xf32> to vector<8x32xbf16>
    %cst_32 = arith.constant dense<0.000000e+00> : vector<8x128xf32>
    %63 = tpu.matmul %62, %2, %cst_32 {dimension_numbers = #tpu.dot_dimension_numbers<[1], [0], [0], [1], [0, 0, 1, 1], [], []>} : vector<8x32xbf16>, vector<32x128xbf16>, vector<8x128xf32> -> vector<8x128xf32>
    %64 = arith.addf %61, %63 : vector<8x128xf32>
    %65 = arith.negf %64 : vector<8x128xf32>
    %66 = math.exp %65 : vector<8x128xf32>
    %cst_33 = arith.constant 1.000000e+00 : f32
    %67 = vector.broadcast %cst_33 : f32 to vector<8x128xf32>
    %68 = arith.addf %67, %66 : vector<8x128xf32>
    %69 = arith.divf %67, %68 : vector<8x128xf32>
    %70 = math.tanh %64 : vector<8x128xf32>
    %71 = vector.extract_strided_slice %69 {offsets = [0, 0], sizes = [8, 32], strides = [1, 1]} : vector<8x128xf32> to vector<8x32xf32>
    %72 = vector.extract_strided_slice %69 {offsets = [0, 32], sizes = [8, 32], strides = [1, 1]} : vector<8x128xf32> to vector<8x32xf32>
    %73 = vector.extract_strided_slice %70 {offsets = [0, 64], sizes = [8, 32], strides = [1, 1]} : vector<8x128xf32> to vector<8x32xf32>
    %74 = vector.extract_strided_slice %69 {offsets = [0, 96], sizes = [8, 32], strides = [1, 1]} : vector<8x128xf32> to vector<8x32xf32>
    %75 = arith.mulf %71, %34 : vector<8x32xf32>
    %76 = arith.mulf %72, %73 : vector<8x32xf32>
    %77 = arith.addf %75, %76 : vector<8x32xf32>
    %78 = math.tanh %77 : vector<8x32xf32>
    %79 = arith.mulf %74, %78 : vector<8x32xf32>
    %80 = arith.truncf %79 : vector<8x32xf32> to vector<8x32xbf16>
    %cst_34 = arith.constant dense<0.000000e+00> : vector<8x128xf32>
    %81 = tpu.matmul %80, %1, %cst_34 {dimension_numbers = #tpu.dot_dimension_numbers<[1], [0], [0], [1], [0, 0, 1, 1], [], []>} : vector<8x32xbf16>, vector<32x128xbf16>, vector<8x128xf32> -> vector<8x128xf32>
    %82 = arith.truncf %51 : vector<8x32xf32> to vector<8x32xbf16>
    %cst_35 = arith.constant dense<0.000000e+00> : vector<8x128xf32>
    %83 = tpu.matmul %82, %3, %cst_35 {dimension_numbers = #tpu.dot_dimension_numbers<[1], [0], [0], [1], [0, 0, 1, 1], [], []>} : vector<8x32xbf16>, vector<32x128xbf16>, vector<8x128xf32> -> vector<8x128xf32>
    %84 = arith.addf %81, %83 : vector<8x128xf32>
    %85 = arith.addf %84, %7 : vector<8x128xf32>
    %86 = arith.negf %85 : vector<8x128xf32>
    %87 = math.exp %86 : vector<8x128xf32>
    %cst_36 = arith.constant 1.000000e+00 : f32
    %88 = vector.broadcast %cst_36 : f32 to vector<8x128xf32>
    %89 = arith.addf %88, %87 : vector<8x128xf32>
    %90 = arith.divf %88, %89 : vector<8x128xf32>
    %91 = math.tanh %85 : vector<8x128xf32>
    %92 = vector.extract_strided_slice %90 {offsets = [0, 0], sizes = [8, 32], strides = [1, 1]} : vector<8x128xf32> to vector<8x32xf32>
    %93 = vector.extract_strided_slice %90 {offsets = [0, 32], sizes = [8, 32], strides = [1, 1]} : vector<8x128xf32> to vector<8x32xf32>
    %94 = vector.extract_strided_slice %91 {offsets = [0, 64], sizes = [8, 32], strides = [1, 1]} : vector<8x128xf32> to vector<8x32xf32>
    %95 = vector.extract_strided_slice %90 {offsets = [0, 96], sizes = [8, 32], strides = [1, 1]} : vector<8x128xf32> to vector<8x32xf32>
    %96 = arith.mulf %92, %52 : vector<8x32xf32>
    %97 = arith.mulf %93, %94 : vector<8x32xf32>
    %98 = arith.addf %96, %97 : vector<8x32xf32>
    %99 = math.tanh %98 : vector<8x32xf32>
    %100 = arith.mulf %95, %99 : vector<8x32xf32>
    %c2 = arith.constant 2 : index
    %c0_37 = arith.constant 0 : index
    %c0_38 = arith.constant 0 : index
    %101 = vector.load %arg11[%c2, %c0_37, %c0_38] : memref<8x8x128xf32, #tpu.memory_space<vmem>>, vector<1x8x128xf32>
    %102 = vector.shape_cast %101 : vector<1x8x128xf32> to vector<8x128xf32>
    %103 = arith.truncf %79 : vector<8x32xf32> to vector<8x32xbf16>
    %cst_39 = arith.constant dense<0.000000e+00> : vector<8x128xf32>
    %104 = tpu.matmul %103, %2, %cst_39 {dimension_numbers = #tpu.dot_dimension_numbers<[1], [0], [0], [1], [0, 0, 1, 1], [], []>} : vector<8x32xbf16>, vector<32x128xbf16>, vector<8x128xf32> -> vector<8x128xf32>
    %105 = arith.addf %102, %104 : vector<8x128xf32>
    %106 = arith.negf %105 : vector<8x128xf32>
    %107 = math.exp %106 : vector<8x128xf32>
    %cst_40 = arith.constant 1.000000e+00 : f32
    %108 = vector.broadcast %cst_40 : f32 to vector<8x128xf32>
    %109 = arith.addf %108, %107 : vector<8x128xf32>
    %110 = arith.divf %108, %109 : vector<8x128xf32>
    %111 = math.tanh %105 : vector<8x128xf32>
    %112 = vector.extract_strided_slice %110 {offsets = [0, 0], sizes = [8, 32], strides = [1, 1]} : vector<8x128xf32> to vector<8x32xf32>
    %113 = vector.extract_strided_slice %110 {offsets = [0, 32], sizes = [8, 32], strides = [1, 1]} : vector<8x128xf32> to vector<8x32xf32>
    %114 = vector.extract_strided_slice %111 {offsets = [0, 64], sizes = [8, 32], strides = [1, 1]} : vector<8x128xf32> to vector<8x32xf32>
    %115 = vector.extract_strided_slice %110 {offsets = [0, 96], sizes = [8, 32], strides = [1, 1]} : vector<8x128xf32> to vector<8x32xf32>
    %116 = arith.mulf %112, %77 : vector<8x32xf32>
    %117 = arith.mulf %113, %114 : vector<8x32xf32>
    %118 = arith.addf %116, %117 : vector<8x32xf32>
    %119 = math.tanh %118 : vector<8x32xf32>
    %120 = arith.mulf %115, %119 : vector<8x32xf32>
    %121 = arith.truncf %120 : vector<8x32xf32> to vector<8x32xbf16>
    %cst_41 = arith.constant dense<0.000000e+00> : vector<8x128xf32>
    %122 = tpu.matmul %121, %1, %cst_41 {dimension_numbers = #tpu.dot_dimension_numbers<[1], [0], [0], [1], [0, 0, 1, 1], [], []>} : vector<8x32xbf16>, vector<32x128xbf16>, vector<8x128xf32> -> vector<8x128xf32>
    %123 = arith.truncf %100 : vector<8x32xf32> to vector<8x32xbf16>
    %cst_42 = arith.constant dense<0.000000e+00> : vector<8x128xf32>
    %124 = tpu.matmul %123, %3, %cst_42 {dimension_numbers = #tpu.dot_dimension_numbers<[1], [0], [0], [1], [0, 0, 1, 1], [], []>} : vector<8x32xbf16>, vector<32x128xbf16>, vector<8x128xf32> -> vector<8x128xf32>
    %125 = arith.addf %122, %124 : vector<8x128xf32>
    %126 = arith.addf %125, %7 : vector<8x128xf32>
    %127 = arith.negf %126 : vector<8x128xf32>
    %128 = math.exp %127 : vector<8x128xf32>
    %cst_43 = arith.constant 1.000000e+00 : f32
    %129 = vector.broadcast %cst_43 : f32 to vector<8x128xf32>
    %130 = arith.addf %129, %128 : vector<8x128xf32>
    %131 = arith.divf %129, %130 : vector<8x128xf32>
    %132 = math.tanh %126 : vector<8x128xf32>
    %133 = vector.extract_strided_slice %131 {offsets = [0, 0], sizes = [8, 32], strides = [1, 1]} : vector<8x128xf32> to vector<8x32xf32>
    %134 = vector.extract_strided_slice %131 {offsets = [0, 32], sizes = [8, 32], strides = [1, 1]} : vector<8x128xf32> to vector<8x32xf32>
    %135 = vector.extract_strided_slice %132 {offsets = [0, 64], sizes = [8, 32], strides = [1, 1]} : vector<8x128xf32> to vector<8x32xf32>
    %136 = vector.extract_strided_slice %131 {offsets = [0, 96], sizes = [8, 32], strides = [1, 1]} : vector<8x128xf32> to vector<8x32xf32>
    %137 = arith.mulf %133, %98 : vector<8x32xf32>
    %138 = arith.mulf %134, %135 : vector<8x32xf32>
    %139 = arith.addf %137, %138 : vector<8x32xf32>
    %140 = math.tanh %139 : vector<8x32xf32>
    %141 = arith.mulf %136, %140 : vector<8x32xf32>
    %c3 = arith.constant 3 : index
    %c0_44 = arith.constant 0 : index
    %c0_45 = arith.constant 0 : index
    %142 = vector.load %arg11[%c3, %c0_44, %c0_45] : memref<8x8x128xf32, #tpu.memory_space<vmem>>, vector<1x8x128xf32>
    %143 = vector.shape_cast %142 : vector<1x8x128xf32> to vector<8x128xf32>
    %144 = arith.truncf %120 : vector<8x32xf32> to vector<8x32xbf16>
    %cst_46 = arith.constant dense<0.000000e+00> : vector<8x128xf32>
    %145 = tpu.matmul %144, %2, %cst_46 {dimension_numbers = #tpu.dot_dimension_numbers<[1], [0], [0], [1], [0, 0, 1, 1], [], []>} : vector<8x32xbf16>, vector<32x128xbf16>, vector<8x128xf32> -> vector<8x128xf32>
    %146 = arith.addf %143, %145 : vector<8x128xf32>
    %147 = arith.negf %146 : vector<8x128xf32>
    %148 = math.exp %147 : vector<8x128xf32>
    %cst_47 = arith.constant 1.000000e+00 : f32
    %149 = vector.broadcast %cst_47 : f32 to vector<8x128xf32>
    %150 = arith.addf %149, %148 : vector<8x128xf32>
    %151 = arith.divf %149, %150 : vector<8x128xf32>
    %152 = math.tanh %146 : vector<8x128xf32>
    %153 = vector.extract_strided_slice %151 {offsets = [0, 0], sizes = [8, 32], strides = [1, 1]} : vector<8x128xf32> to vector<8x32xf32>
    %154 = vector.extract_strided_slice %151 {offsets = [0, 32], sizes = [8, 32], strides = [1, 1]} : vector<8x128xf32> to vector<8x32xf32>
    %155 = vector.extract_strided_slice %152 {offsets = [0, 64], sizes = [8, 32], strides = [1, 1]} : vector<8x128xf32> to vector<8x32xf32>
    %156 = vector.extract_strided_slice %151 {offsets = [0, 96], sizes = [8, 32], strides = [1, 1]} : vector<8x128xf32> to vector<8x32xf32>
    %157 = arith.mulf %153, %118 : vector<8x32xf32>
    %158 = arith.mulf %154, %155 : vector<8x32xf32>
    %159 = arith.addf %157, %158 : vector<8x32xf32>
    %160 = math.tanh %159 : vector<8x32xf32>
    %161 = arith.mulf %156, %160 : vector<8x32xf32>
    %162 = arith.truncf %161 : vector<8x32xf32> to vector<8x32xbf16>
    %cst_48 = arith.constant dense<0.000000e+00> : vector<8x128xf32>
    %163 = tpu.matmul %162, %1, %cst_48 {dimension_numbers = #tpu.dot_dimension_numbers<[1], [0], [0], [1], [0, 0, 1, 1], [], []>} : vector<8x32xbf16>, vector<32x128xbf16>, vector<8x128xf32> -> vector<8x128xf32>
    %164 = arith.truncf %141 : vector<8x32xf32> to vector<8x32xbf16>
    %cst_49 = arith.constant dense<0.000000e+00> : vector<8x128xf32>
    %165 = tpu.matmul %164, %3, %cst_49 {dimension_numbers = #tpu.dot_dimension_numbers<[1], [0], [0], [1], [0, 0, 1, 1], [], []>} : vector<8x32xbf16>, vector<32x128xbf16>, vector<8x128xf32> -> vector<8x128xf32>
    %166 = arith.addf %163, %165 : vector<8x128xf32>
    %167 = arith.addf %166, %7 : vector<8x128xf32>
    %168 = arith.negf %167 : vector<8x128xf32>
    %169 = math.exp %168 : vector<8x128xf32>
    %cst_50 = arith.constant 1.000000e+00 : f32
    %170 = vector.broadcast %cst_50 : f32 to vector<8x128xf32>
    %171 = arith.addf %170, %169 : vector<8x128xf32>
    %172 = arith.divf %170, %171 : vector<8x128xf32>
    %173 = math.tanh %167 : vector<8x128xf32>
    %174 = vector.extract_strided_slice %172 {offsets = [0, 0], sizes = [8, 32], strides = [1, 1]} : vector<8x128xf32> to vector<8x32xf32>
    %175 = vector.extract_strided_slice %172 {offsets = [0, 32], sizes = [8, 32], strides = [1, 1]} : vector<8x128xf32> to vector<8x32xf32>
    %176 = vector.extract_strided_slice %173 {offsets = [0, 64], sizes = [8, 32], strides = [1, 1]} : vector<8x128xf32> to vector<8x32xf32>
    %177 = vector.extract_strided_slice %172 {offsets = [0, 96], sizes = [8, 32], strides = [1, 1]} : vector<8x128xf32> to vector<8x32xf32>
    %178 = arith.mulf %174, %139 : vector<8x32xf32>
    %179 = arith.mulf %175, %176 : vector<8x32xf32>
    %180 = arith.addf %178, %179 : vector<8x32xf32>
    %181 = math.tanh %180 : vector<8x32xf32>
    %182 = arith.mulf %177, %181 : vector<8x32xf32>
    %c4 = arith.constant 4 : index
    %c0_51 = arith.constant 0 : index
    %c0_52 = arith.constant 0 : index
    %183 = vector.load %arg11[%c4, %c0_51, %c0_52] : memref<8x8x128xf32, #tpu.memory_space<vmem>>, vector<1x8x128xf32>
    %184 = vector.shape_cast %183 : vector<1x8x128xf32> to vector<8x128xf32>
    %185 = arith.truncf %161 : vector<8x32xf32> to vector<8x32xbf16>
    %cst_53 = arith.constant dense<0.000000e+00> : vector<8x128xf32>
    %186 = tpu.matmul %185, %2, %cst_53 {dimension_numbers = #tpu.dot_dimension_numbers<[1], [0], [0], [1], [0, 0, 1, 1], [], []>} : vector<8x32xbf16>, vector<32x128xbf16>, vector<8x128xf32> -> vector<8x128xf32>
    %187 = arith.addf %184, %186 : vector<8x128xf32>
    %188 = arith.negf %187 : vector<8x128xf32>
    %189 = math.exp %188 : vector<8x128xf32>
    %cst_54 = arith.constant 1.000000e+00 : f32
    %190 = vector.broadcast %cst_54 : f32 to vector<8x128xf32>
    %191 = arith.addf %190, %189 : vector<8x128xf32>
    %192 = arith.divf %190, %191 : vector<8x128xf32>
    %193 = math.tanh %187 : vector<8x128xf32>
    %194 = vector.extract_strided_slice %192 {offsets = [0, 0], sizes = [8, 32], strides = [1, 1]} : vector<8x128xf32> to vector<8x32xf32>
    %195 = vector.extract_strided_slice %192 {offsets = [0, 32], sizes = [8, 32], strides = [1, 1]} : vector<8x128xf32> to vector<8x32xf32>
    %196 = vector.extract_strided_slice %193 {offsets = [0, 64], sizes = [8, 32], strides = [1, 1]} : vector<8x128xf32> to vector<8x32xf32>
    %197 = vector.extract_strided_slice %192 {offsets = [0, 96], sizes = [8, 32], strides = [1, 1]} : vector<8x128xf32> to vector<8x32xf32>
    %198 = arith.mulf %194, %159 : vector<8x32xf32>
    %199 = arith.mulf %195, %196 : vector<8x32xf32>
    %200 = arith.addf %198, %199 : vector<8x32xf32>
    %201 = math.tanh %200 : vector<8x32xf32>
    %202 = arith.mulf %197, %201 : vector<8x32xf32>
    %203 = arith.truncf %202 : vector<8x32xf32> to vector<8x32xbf16>
    %cst_55 = arith.constant dense<0.000000e+00> : vector<8x128xf32>
    %204 = tpu.matmul %203, %1, %cst_55 {dimension_numbers = #tpu.dot_dimension_numbers<[1], [0], [0], [1], [0, 0, 1, 1], [], []>} : vector<8x32xbf16>, vector<32x128xbf16>, vector<8x128xf32> -> vector<8x128xf32>
    %205 = arith.truncf %182 : vector<8x32xf32> to vector<8x32xbf16>
    %cst_56 = arith.constant dense<0.000000e+00> : vector<8x128xf32>
    %206 = tpu.matmul %205, %3, %cst_56 {dimension_numbers = #tpu.dot_dimension_numbers<[1], [0], [0], [1], [0, 0, 1, 1], [], []>} : vector<8x32xbf16>, vector<32x128xbf16>, vector<8x128xf32> -> vector<8x128xf32>
    %207 = arith.addf %204, %206 : vector<8x128xf32>
    %208 = arith.addf %207, %7 : vector<8x128xf32>
    %209 = arith.negf %208 : vector<8x128xf32>
    %210 = math.exp %209 : vector<8x128xf32>
    %cst_57 = arith.constant 1.000000e+00 : f32
    %211 = vector.broadcast %cst_57 : f32 to vector<8x128xf32>
    %212 = arith.addf %211, %210 : vector<8x128xf32>
    %213 = arith.divf %211, %212 : vector<8x128xf32>
    %214 = math.tanh %208 : vector<8x128xf32>
    %215 = vector.extract_strided_slice %213 {offsets = [0, 0], sizes = [8, 32], strides = [1, 1]} : vector<8x128xf32> to vector<8x32xf32>
    %216 = vector.extract_strided_slice %213 {offsets = [0, 32], sizes = [8, 32], strides = [1, 1]} : vector<8x128xf32> to vector<8x32xf32>
    %217 = vector.extract_strided_slice %214 {offsets = [0, 64], sizes = [8, 32], strides = [1, 1]} : vector<8x128xf32> to vector<8x32xf32>
    %218 = vector.extract_strided_slice %213 {offsets = [0, 96], sizes = [8, 32], strides = [1, 1]} : vector<8x128xf32> to vector<8x32xf32>
    %219 = arith.mulf %215, %180 : vector<8x32xf32>
    %220 = arith.mulf %216, %217 : vector<8x32xf32>
    %221 = arith.addf %219, %220 : vector<8x32xf32>
    %222 = math.tanh %221 : vector<8x32xf32>
    %223 = arith.mulf %218, %222 : vector<8x32xf32>
    %c5 = arith.constant 5 : index
    %c0_58 = arith.constant 0 : index
    %c0_59 = arith.constant 0 : index
    %224 = vector.load %arg11[%c5, %c0_58, %c0_59] : memref<8x8x128xf32, #tpu.memory_space<vmem>>, vector<1x8x128xf32>
    %225 = vector.shape_cast %224 : vector<1x8x128xf32> to vector<8x128xf32>
    %226 = arith.truncf %202 : vector<8x32xf32> to vector<8x32xbf16>
    %cst_60 = arith.constant dense<0.000000e+00> : vector<8x128xf32>
    %227 = tpu.matmul %226, %2, %cst_60 {dimension_numbers = #tpu.dot_dimension_numbers<[1], [0], [0], [1], [0, 0, 1, 1], [], []>} : vector<8x32xbf16>, vector<32x128xbf16>, vector<8x128xf32> -> vector<8x128xf32>
    %228 = arith.addf %225, %227 : vector<8x128xf32>
    %229 = arith.negf %228 : vector<8x128xf32>
    %230 = math.exp %229 : vector<8x128xf32>
    %cst_61 = arith.constant 1.000000e+00 : f32
    %231 = vector.broadcast %cst_61 : f32 to vector<8x128xf32>
    %232 = arith.addf %231, %230 : vector<8x128xf32>
    %233 = arith.divf %231, %232 : vector<8x128xf32>
    %234 = math.tanh %228 : vector<8x128xf32>
    %235 = vector.extract_strided_slice %233 {offsets = [0, 0], sizes = [8, 32], strides = [1, 1]} : vector<8x128xf32> to vector<8x32xf32>
    %236 = vector.extract_strided_slice %233 {offsets = [0, 32], sizes = [8, 32], strides = [1, 1]} : vector<8x128xf32> to vector<8x32xf32>
    %237 = vector.extract_strided_slice %234 {offsets = [0, 64], sizes = [8, 32], strides = [1, 1]} : vector<8x128xf32> to vector<8x32xf32>
    %238 = vector.extract_strided_slice %233 {offsets = [0, 96], sizes = [8, 32], strides = [1, 1]} : vector<8x128xf32> to vector<8x32xf32>
    %239 = arith.mulf %235, %200 : vector<8x32xf32>
    %240 = arith.mulf %236, %237 : vector<8x32xf32>
    %241 = arith.addf %239, %240 : vector<8x32xf32>
    %242 = math.tanh %241 : vector<8x32xf32>
    %243 = arith.mulf %238, %242 : vector<8x32xf32>
    %244 = arith.truncf %243 : vector<8x32xf32> to vector<8x32xbf16>
    %cst_62 = arith.constant dense<0.000000e+00> : vector<8x128xf32>
    %245 = tpu.matmul %244, %1, %cst_62 {dimension_numbers = #tpu.dot_dimension_numbers<[1], [0], [0], [1], [0, 0, 1, 1], [], []>} : vector<8x32xbf16>, vector<32x128xbf16>, vector<8x128xf32> -> vector<8x128xf32>
    %246 = arith.truncf %223 : vector<8x32xf32> to vector<8x32xbf16>
    %cst_63 = arith.constant dense<0.000000e+00> : vector<8x128xf32>
    %247 = tpu.matmul %246, %3, %cst_63 {dimension_numbers = #tpu.dot_dimension_numbers<[1], [0], [0], [1], [0, 0, 1, 1], [], []>} : vector<8x32xbf16>, vector<32x128xbf16>, vector<8x128xf32> -> vector<8x128xf32>
    %248 = arith.addf %245, %247 : vector<8x128xf32>
    %249 = arith.addf %248, %7 : vector<8x128xf32>
    %250 = arith.negf %249 : vector<8x128xf32>
    %251 = math.exp %250 : vector<8x128xf32>
    %cst_64 = arith.constant 1.000000e+00 : f32
    %252 = vector.broadcast %cst_64 : f32 to vector<8x128xf32>
    %253 = arith.addf %252, %251 : vector<8x128xf32>
    %254 = arith.divf %252, %253 : vector<8x128xf32>
    %255 = math.tanh %249 : vector<8x128xf32>
    %256 = vector.extract_strided_slice %254 {offsets = [0, 0], sizes = [8, 32], strides = [1, 1]} : vector<8x128xf32> to vector<8x32xf32>
    %257 = vector.extract_strided_slice %254 {offsets = [0, 32], sizes = [8, 32], strides = [1, 1]} : vector<8x128xf32> to vector<8x32xf32>
    %258 = vector.extract_strided_slice %255 {offsets = [0, 64], sizes = [8, 32], strides = [1, 1]} : vector<8x128xf32> to vector<8x32xf32>
    %259 = vector.extract_strided_slice %254 {offsets = [0, 96], sizes = [8, 32], strides = [1, 1]} : vector<8x128xf32> to vector<8x32xf32>
    %260 = arith.mulf %256, %221 : vector<8x32xf32>
    %261 = arith.mulf %257, %258 : vector<8x32xf32>
    %262 = arith.addf %260, %261 : vector<8x32xf32>
    %263 = math.tanh %262 : vector<8x32xf32>
    %264 = arith.mulf %259, %263 : vector<8x32xf32>
    %c6 = arith.constant 6 : index
    %c0_65 = arith.constant 0 : index
    %c0_66 = arith.constant 0 : index
    %265 = vector.load %arg11[%c6, %c0_65, %c0_66] : memref<8x8x128xf32, #tpu.memory_space<vmem>>, vector<1x8x128xf32>
    %266 = vector.shape_cast %265 : vector<1x8x128xf32> to vector<8x128xf32>
    %267 = arith.truncf %243 : vector<8x32xf32> to vector<8x32xbf16>
    %cst_67 = arith.constant dense<0.000000e+00> : vector<8x128xf32>
    %268 = tpu.matmul %267, %2, %cst_67 {dimension_numbers = #tpu.dot_dimension_numbers<[1], [0], [0], [1], [0, 0, 1, 1], [], []>} : vector<8x32xbf16>, vector<32x128xbf16>, vector<8x128xf32> -> vector<8x128xf32>
    %269 = arith.addf %266, %268 : vector<8x128xf32>
    %270 = arith.negf %269 : vector<8x128xf32>
    %271 = math.exp %270 : vector<8x128xf32>
    %cst_68 = arith.constant 1.000000e+00 : f32
    %272 = vector.broadcast %cst_68 : f32 to vector<8x128xf32>
    %273 = arith.addf %272, %271 : vector<8x128xf32>
    %274 = arith.divf %272, %273 : vector<8x128xf32>
    %275 = math.tanh %269 : vector<8x128xf32>
    %276 = vector.extract_strided_slice %274 {offsets = [0, 0], sizes = [8, 32], strides = [1, 1]} : vector<8x128xf32> to vector<8x32xf32>
    %277 = vector.extract_strided_slice %274 {offsets = [0, 32], sizes = [8, 32], strides = [1, 1]} : vector<8x128xf32> to vector<8x32xf32>
    %278 = vector.extract_strided_slice %275 {offsets = [0, 64], sizes = [8, 32], strides = [1, 1]} : vector<8x128xf32> to vector<8x32xf32>
    %279 = vector.extract_strided_slice %274 {offsets = [0, 96], sizes = [8, 32], strides = [1, 1]} : vector<8x128xf32> to vector<8x32xf32>
    %280 = arith.mulf %276, %241 : vector<8x32xf32>
    %281 = arith.mulf %277, %278 : vector<8x32xf32>
    %282 = arith.addf %280, %281 : vector<8x32xf32>
    %283 = math.tanh %282 : vector<8x32xf32>
    %284 = arith.mulf %279, %283 : vector<8x32xf32>
    %285 = arith.truncf %284 : vector<8x32xf32> to vector<8x32xbf16>
    %cst_69 = arith.constant dense<0.000000e+00> : vector<8x128xf32>
    %286 = tpu.matmul %285, %1, %cst_69 {dimension_numbers = #tpu.dot_dimension_numbers<[1], [0], [0], [1], [0, 0, 1, 1], [], []>} : vector<8x32xbf16>, vector<32x128xbf16>, vector<8x128xf32> -> vector<8x128xf32>
    %287 = arith.truncf %264 : vector<8x32xf32> to vector<8x32xbf16>
    %cst_70 = arith.constant dense<0.000000e+00> : vector<8x128xf32>
    %288 = tpu.matmul %287, %3, %cst_70 {dimension_numbers = #tpu.dot_dimension_numbers<[1], [0], [0], [1], [0, 0, 1, 1], [], []>} : vector<8x32xbf16>, vector<32x128xbf16>, vector<8x128xf32> -> vector<8x128xf32>
    %289 = arith.addf %286, %288 : vector<8x128xf32>
    %290 = arith.addf %289, %7 : vector<8x128xf32>
    %291 = arith.negf %290 : vector<8x128xf32>
    %292 = math.exp %291 : vector<8x128xf32>
    %cst_71 = arith.constant 1.000000e+00 : f32
    %293 = vector.broadcast %cst_71 : f32 to vector<8x128xf32>
    %294 = arith.addf %293, %292 : vector<8x128xf32>
    %295 = arith.divf %293, %294 : vector<8x128xf32>
    %296 = math.tanh %290 : vector<8x128xf32>
    %297 = vector.extract_strided_slice %295 {offsets = [0, 0], sizes = [8, 32], strides = [1, 1]} : vector<8x128xf32> to vector<8x32xf32>
    %298 = vector.extract_strided_slice %295 {offsets = [0, 32], sizes = [8, 32], strides = [1, 1]} : vector<8x128xf32> to vector<8x32xf32>
    %299 = vector.extract_strided_slice %296 {offsets = [0, 64], sizes = [8, 32], strides = [1, 1]} : vector<8x128xf32> to vector<8x32xf32>
    %300 = vector.extract_strided_slice %295 {offsets = [0, 96], sizes = [8, 32], strides = [1, 1]} : vector<8x128xf32> to vector<8x32xf32>
    %301 = arith.mulf %297, %262 : vector<8x32xf32>
    %302 = arith.mulf %298, %299 : vector<8x32xf32>
    %303 = arith.addf %301, %302 : vector<8x32xf32>
    %304 = math.tanh %303 : vector<8x32xf32>
    %305 = arith.mulf %300, %304 : vector<8x32xf32>
    %c7_72 = arith.constant 7 : index
    %c0_73 = arith.constant 0 : index
    %c0_74 = arith.constant 0 : index
    %306 = vector.load %arg11[%c7_72, %c0_73, %c0_74] : memref<8x8x128xf32, #tpu.memory_space<vmem>>, vector<1x8x128xf32>
    %307 = vector.shape_cast %306 : vector<1x8x128xf32> to vector<8x128xf32>
    %308 = arith.truncf %284 : vector<8x32xf32> to vector<8x32xbf16>
    %cst_75 = arith.constant dense<0.000000e+00> : vector<8x128xf32>
    %309 = tpu.matmul %308, %2, %cst_75 {dimension_numbers = #tpu.dot_dimension_numbers<[1], [0], [0], [1], [0, 0, 1, 1], [], []>} : vector<8x32xbf16>, vector<32x128xbf16>, vector<8x128xf32> -> vector<8x128xf32>
    %310 = arith.addf %307, %309 : vector<8x128xf32>
    %311 = arith.negf %310 : vector<8x128xf32>
    %312 = math.exp %311 : vector<8x128xf32>
    %cst_76 = arith.constant 1.000000e+00 : f32
    %313 = vector.broadcast %cst_76 : f32 to vector<8x128xf32>
    %314 = arith.addf %313, %312 : vector<8x128xf32>
    %315 = arith.divf %313, %314 : vector<8x128xf32>
    %316 = math.tanh %310 : vector<8x128xf32>
    %317 = vector.extract_strided_slice %315 {offsets = [0, 0], sizes = [8, 32], strides = [1, 1]} : vector<8x128xf32> to vector<8x32xf32>
    %318 = vector.extract_strided_slice %315 {offsets = [0, 32], sizes = [8, 32], strides = [1, 1]} : vector<8x128xf32> to vector<8x32xf32>
    %319 = vector.extract_strided_slice %316 {offsets = [0, 64], sizes = [8, 32], strides = [1, 1]} : vector<8x128xf32> to vector<8x32xf32>
    %320 = vector.extract_strided_slice %315 {offsets = [0, 96], sizes = [8, 32], strides = [1, 1]} : vector<8x128xf32> to vector<8x32xf32>
    %321 = arith.mulf %317, %282 : vector<8x32xf32>
    %322 = arith.mulf %318, %319 : vector<8x32xf32>
    %323 = arith.addf %321, %322 : vector<8x32xf32>
    %324 = math.tanh %323 : vector<8x32xf32>
    %325 = arith.mulf %320, %324 : vector<8x32xf32>
    %326 = arith.truncf %325 : vector<8x32xf32> to vector<8x32xbf16>
    %cst_77 = arith.constant dense<0.000000e+00> : vector<8x128xf32>
    %327 = tpu.matmul %326, %1, %cst_77 {dimension_numbers = #tpu.dot_dimension_numbers<[1], [0], [0], [1], [0, 0, 1, 1], [], []>} : vector<8x32xbf16>, vector<32x128xbf16>, vector<8x128xf32> -> vector<8x128xf32>
    %328 = arith.truncf %305 : vector<8x32xf32> to vector<8x32xbf16>
    %cst_78 = arith.constant dense<0.000000e+00> : vector<8x128xf32>
    %329 = tpu.matmul %328, %3, %cst_78 {dimension_numbers = #tpu.dot_dimension_numbers<[1], [0], [0], [1], [0, 0, 1, 1], [], []>} : vector<8x32xbf16>, vector<32x128xbf16>, vector<8x128xf32> -> vector<8x128xf32>
    %330 = arith.addf %327, %329 : vector<8x128xf32>
    %331 = arith.addf %330, %7 : vector<8x128xf32>
    %332 = arith.negf %331 : vector<8x128xf32>
    %333 = math.exp %332 : vector<8x128xf32>
    %cst_79 = arith.constant 1.000000e+00 : f32
    %334 = vector.broadcast %cst_79 : f32 to vector<8x128xf32>
    %335 = arith.addf %334, %333 : vector<8x128xf32>
    %336 = arith.divf %334, %335 : vector<8x128xf32>
    %337 = math.tanh %331 : vector<8x128xf32>
    %338 = vector.extract_strided_slice %336 {offsets = [0, 0], sizes = [8, 32], strides = [1, 1]} : vector<8x128xf32> to vector<8x32xf32>
    %339 = vector.extract_strided_slice %336 {offsets = [0, 32], sizes = [8, 32], strides = [1, 1]} : vector<8x128xf32> to vector<8x32xf32>
    %340 = vector.extract_strided_slice %337 {offsets = [0, 64], sizes = [8, 32], strides = [1, 1]} : vector<8x128xf32> to vector<8x32xf32>
    %341 = vector.extract_strided_slice %336 {offsets = [0, 96], sizes = [8, 32], strides = [1, 1]} : vector<8x128xf32> to vector<8x32xf32>
    %342 = arith.mulf %338, %303 : vector<8x32xf32>
    %343 = arith.mulf %339, %340 : vector<8x32xf32>
    %344 = arith.addf %342, %343 : vector<8x32xf32>
    %345 = math.tanh %344 : vector<8x32xf32>
    %346 = arith.mulf %341, %345 : vector<8x32xf32>
    %c0_80 = arith.constant 0 : index
    %c0_81 = arith.constant 0 : index
    %347 = vector.load %arg7[%c0_80, %c0_81] : memref<32x128xbf16, #tpu.memory_space<vmem>>, vector<32x128xbf16>
    %348 = arith.truncf %346 : vector<8x32xf32> to vector<8x32xbf16>
    %cst_82 = arith.constant dense<0.000000e+00> : vector<8x128xf32>
    %349 = tpu.matmul %348, %347, %cst_82 {dimension_numbers = #tpu.dot_dimension_numbers<[1], [0], [0], [1], [0, 0, 1, 1], [], []>} : vector<8x32xbf16>, vector<32x128xbf16>, vector<8x128xf32> -> vector<8x128xf32>
    %350 = arith.addf %349, %59 : vector<8x128xf32>
    %c0_83 = arith.constant 0 : index
    %c0_84 = arith.constant 0 : index
    %351 = vector.load %arg10[%c0_83, %c0_84] : memref<8x128xf32, #tpu.memory_space<vmem>>, vector<8x128xf32>
    tpu.vector_store %arg10[%c0_83, %c0_84], %350 {strides = array<i32>} : memref<8x128xf32, #tpu.memory_space<vmem>>, vector<8x128xf32>,
    return
  }
}

</mosaic_0001>

<bundles_post_ra>
// kernel: tpu_custom_call.1
= control target key start
LH: loop header
LB: loop body
LE: loop exit
PB: predicated region body
PF: predicated region fallthrough
CT: control target
= control target key end

     0   :  { %15 = vsyncpa [#allocation4], 0  ;;  %s3079_s0 = inlined_call_operand.hbm [shape: f32[8,8,16], index: 0, kind: input, shape index: {}]   ;;  %s3080_s1 = inlined_call_operand.hbm [shape: bf16[16,128], index: 1, kind: input, shape index: {}]   ;;  %s3081_s2 = inlined_call_operand.hbm [shape: bf16[32,128], index: 2, kind: input, shape index: {}]   ;;  %s3082_s3 = inlined_call_operand.vmem [shape: f32[1,128], index: 3, kind: input, shape index: {}]   ;;  %s3083_s4 = inlined_call_operand.hbm [shape: bf16[32,128], index: 4, kind: input, shape index: {}]   ;;  %s3084_s5 = inlined_call_operand.vmem [shape: bf16[32,128], index: 5, kind: input, shape index: {}]   ;;  %s3085_s6 = inlined_call_operand.vmem [shape: f32[1,128], index: 6, kind: input, shape index: {}]   ;;  %s3086_s7 = inlined_call_operand.hbm [shape: bf16[32,128], index: 7, kind: input, shape index: {}]   ;;  %s3087_s8 = inlined_call_operand.hbm [shape: bf16[32,128], index: 8, kind: input, shape index: {}]   ;;  %s3088_s9 = inlined_call_operand.vmem [shape: f32[1,128], index: 9, kind: input, shape index: {}]   ;;  %s3089_s10 = inlined_call_operand.hbm [shape: f32[8,128], index: 10, kind: output, shape index: {}]  }
   0x1   :  { %16 = vsyncpa [#allocation7], 0 }
   0x2   :  { %17 = vsyncpa [#allocation10], 0 }
   0x3   :  { %18 = vsyncpa [#allocation13], 0 }
   0x4   :  { %19 = vsyncpa [#allocation5], 0  ;;  %s2561_s13 = smov [#allocation6]   ;;  %s2397_s17 = scalar_lea.hbm %s3080_s1, 128 }
   0x5   :  { %s37_s14 = sshll.u32 %s2561_s13, 4  ;;  %p2398_p0 = scmp.ne.s32.totalorder %s3080_s1, %s2397_s17  ;;  %s38_s14 = int_to_ptr.vmem [resolvable:$true] %s37_s14 }
   0x6   :  { %p2401_p1 = scmp.lt.u32.totalorder %s2397_s17, %s3080_s1 }
   0x8   :  { %p2403_p2 = pnand %p2401_p1, %p2398_p0 }
   0xa   :  { %2406 = shalt.err (!%p2403_p2)
}
   0xb   :  { %s2407_s22 = scalar_lea.vmem %s38_s14, 128  ;;  %p2412_p4 = scmp.lt.s32.totalorder %s38_s14, %s38_s14 }
   0xc   :  { %p2408_p3 = scmp.ne.s32.totalorder %s38_s14, %s2407_s22  ;;  %p2413_p5 = scmp.lt.s32.totalorder %s2407_s22, %s2407_s22 }
   0xe   :  { %p2414_p6 = por %p2413_p5, %p2412_p4 }
  0x10   :  { %p2415_p7 = pnand %p2414_p6, %p2408_p3 }
  0x12   :  { %2418 = shalt.err (!%p2415_p7)
}
  0x13   :  { %s2562_s23 = smov 64   ;;  %s2563_s24 = smov 4  }
  0x14   :  { %43 = dma.hbm_to_vmem [thread:$0]  %s3080_s1, 128, %s38_s14, [#allocation7], %s2562_s23, %s2562_s23, %s2563_s24  }
  0x15   :  { %s2564_s27 = smov [#allocation9]   ;;  %s2565_s29 = smov [#allocation3]  }
  0x16   :  { %s63_s28 = sshll.u32 %s2564_s27, 4  ;;  %s25_s30 = sshll.u32 %s2565_s29, 4  ;;  %s64_s28 = int_to_ptr.vmem [resolvable:$true] %s63_s28  ;;  %s26_s30 = int_to_ptr.vmem [resolvable:$true] %s25_s30 }
  0x17   :  { %s2419_s13 = scalar_lea.hbm %s3083_s4, 256 }
  0x18   :  { %p2420_p8 = scmp.ne.s32.totalorder %s3083_s4, %s2419_s13  ;;  %p2423_p9 = scmp.lt.u32.totalorder %s2419_s13, %s3083_s4 }
  0x1a   :  { %p2425_p10 = pnand %p2423_p9, %p2420_p8 }
  0x1c   :  { %2428 = shalt.err (!%p2425_p10)
}
  0x1d   :  { %s2429_s1 = scalar_lea.vmem %s64_s28, 256  ;;  %p2434_p12 = scmp.lt.s32.totalorder %s64_s28, %s64_s28 }
  0x1e   :  { %p2430_p11 = scmp.ne.s32.totalorder %s64_s28, %s2429_s1  ;;  %p2435_p13 = scmp.lt.s32.totalorder %s2429_s1, %s2429_s1 }
  0x20   :  { %p2436_p0 = por %p2435_p13, %p2434_p12 }
  0x22   :  { %p2437_p1 = pnand %p2436_p0, %p2430_p11 }
  0x24   :  { %2440 = shalt.err (!%p2437_p1)
}
  0x25   :  { %69 = dma.hbm_to_vmem [thread:$0]  %s3083_s4, 256, %s64_s28, [#allocation10], %s2562_s23, %s2562_s23, %s2563_s24  }
  0x26   :  { %s2441_s22 = scalar_lea.hbm %s3079_s0, 1024 }
  0x27   :  { %p2442_p2 = scmp.ne.s32.totalorder %s3079_s0, %s2441_s22  ;;  %p2445_p3 = scmp.lt.u32.totalorder %s2441_s22, %s3079_s0 }
  0x29   :  { %p2447_p4 = pnand %p2445_p3, %p2442_p2 }
  0x2b   :  { %2450 = shalt.err (!%p2447_p4)
}
  0x2c   :  { %s2451_s11 = scalar_lea.vmem %s26_s30, 1024  ;;  %p2456_p6 = scmp.lt.s32.totalorder %s26_s30, %s26_s30 }
  0x2d   :  { %p2452_p5 = scmp.ne.s32.totalorder %s26_s30, %s2451_s11  ;;  %p2457_p7 = scmp.lt.s32.totalorder %s2451_s11, %s2451_s11 }
  0x2f   :  { %p2458_p8 = por %p2457_p7, %p2456_p6 }
  0x31   :  { %p2459_p9 = pnand %p2458_p8, %p2452_p5 }
  0x33   :  { %2462 = shalt.err (!%p2459_p9)
}
  0x34   :  { %s2566_s4 = smov 128   ;;  %s2567_s28 = smov 8  }
  0x35   :  { %31 = dma.hbm_to_vmem [thread:$0]  %s3079_s0, 1024, %s26_s30, [#allocation4], %s2566_s4, %s2566_s4, %s2567_s28  }
  0x36   :  { %s2568_s15 = smov [#allocation8]   ;;  %s2569_s17 = smov [#allocation11]  }
  0x37   :  { %s49_s16 = sshll.u32 %s2568_s15, 4  ;;  %s79_s18 = sshll.u32 %s2569_s17, 4  ;;  %s50_s16 = int_to_ptr.vmem [resolvable:$true] %s49_s16  ;;  %s80_s18 = int_to_ptr.vmem [resolvable:$true] %s79_s18 }
  0x38   :  { %s2463_s19 = scalar_lea.hbm %s3081_s2, 256 }
  0x39   :  { %p2464_p10 = scmp.ne.s32.totalorder %s3081_s2, %s2463_s19  ;;  %p2467_p11 = scmp.lt.u32.totalorder %s2463_s19, %s3081_s2 }
  0x3b   :  { %p2469_p12 = pnand %p2467_p11, %p2464_p10 }
  0x3d   :  { %2472 = shalt.err (!%p2469_p12)
}
  0x3e   :  { %s2473_s0 = scalar_lea.vmem %s50_s16, 256  ;;  %p2478_p0 = scmp.lt.s32.totalorder %s50_s16, %s50_s16 }
  0x3f   :  { %p2474_p13 = scmp.ne.s32.totalorder %s50_s16, %s2473_s0  ;;  %p2479_p1 = scmp.lt.s32.totalorder %s2473_s0, %s2473_s0 }
  0x41   :  { %p2480_p2 = por %p2479_p1, %p2478_p0 }
  0x43   :  { %p2481_p3 = pnand %p2480_p2, %p2474_p13 }
  0x45   :  { %2484 = shalt.err (!%p2481_p3)
}
  0x46   :  { %55 = dma.hbm_to_vmem [thread:$0]  %s3081_s2, 256, %s50_s16, [#allocation7], %s2562_s23, %s2562_s23, %s2563_s24  }
  0x47   :  { %s2485_s11 = scalar_lea.hbm %s3086_s7, 256 }
  0x48   :  { %p2486_p4 = scmp.ne.s32.totalorder %s3086_s7, %s2485_s11  ;;  %p2489_p5 = scmp.lt.u32.totalorder %s2485_s11, %s3086_s7 }
  0x4a   :  { %p2491_p6 = pnand %p2489_p5, %p2486_p4 }
  0x4c   :  { %2494 = shalt.err (!%p2491_p6)
}
  0x4d   :  { %s2495_s15 = scalar_lea.vmem %s80_s18, 256  ;;  %p2500_p8 = scmp.lt.s32.totalorder %s80_s18, %s80_s18 }
  0x4e   :  { %p2496_p7 = scmp.ne.s32.totalorder %s80_s18, %s2495_s15  ;;  %p2501_p9 = scmp.lt.s32.totalorder %s2495_s15, %s2495_s15 }
  0x50   :  { %p2502_p10 = por %p2501_p9, %p2500_p8 }
  0x52   :  { %p2503_p11 = pnand %p2502_p10, %p2496_p7 }
  0x54   :  { %2506 = shalt.err (!%p2503_p11)
}
  0x55   :  { %85 = dma.hbm_to_vmem [thread:$0]  %s3086_s7, 256, %s80_s18, [#allocation10], %s2562_s23, %s2562_s23, %s2563_s24  }
  0x56   :  { %s2570_s17 = smov [#allocation12]   ;;  %s2507_s20 = scalar_lea.hbm %s3087_s8, 256 }
  0x57   :  { %s91_s1 = sshll.u32 %s2570_s17, 4  ;;  %p2508_p12 = scmp.ne.s32.totalorder %s3087_s8, %s2507_s20  ;;  %s92_s1 = int_to_ptr.vmem [resolvable:$true] %s91_s1 }
  0x58   :  { %p2511_p13 = scmp.lt.u32.totalorder %s2507_s20, %s3087_s8 }
  0x5a   :  { %p2513_p0 = pnand %p2511_p13, %p2508_p12 }
  0x5c   :  { %2516 = shalt.err (!%p2513_p0)
}
  0x5d   :  { %s2517_s30 = scalar_lea.vmem %s92_s1, 256  ;;  %p2522_p2 = scmp.lt.s32.totalorder %s92_s1, %s92_s1 }
  0x5e   :  { %p2518_p1 = scmp.ne.s32.totalorder %s92_s1, %s2517_s30  ;;  %p2523_p3 = scmp.lt.s32.totalorder %s2517_s30, %s2517_s30 }
  0x60   :  { %p2524_p4 = por %p2523_p3, %p2522_p2 }
  0x62   :  { %p2525_p5 = pnand %p2524_p4, %p2518_p1 }
  0x64   :  { %2528 = shalt.err (!%p2525_p5)
}
  0x65   :  { %97 = dma.hbm_to_vmem [thread:$0]  %s3087_s8, 256, %s92_s1, [#allocation13], %s2562_s23, %s2562_s23, %s2563_s24  }
  0x66   :  { %2551 = dma.done.wait [#allocation4], 1024  }
  0x67   :  { %2552 = vsyncadd [#allocation4], 4294966272 }
  0x68   :  { %2553 = dma.done.wait [#allocation7], 384  }
  0x69   :  { %2554 = vsyncadd [#allocation7], 4294966912 }
  0x6a   :  { %2555 = dma.done.wait [#allocation10], 512  }
  0x6b   :  { %2556 = vsyncadd [#allocation10], 4294966784 }
  0x6c   :  { %2557 = dma.done.wait [#allocation13], 256  }
  0x6d   :  { %2558 = vsyncadd [#allocation13], 4294967040  ;;  %v2237_v0 = vld [vmem:[#allocation6] sm:$0xff]   ;;  %v142_v2 = vld [vmem:[#allocation3 + $0x8] sm:$0xff]  ;;  %vm165_vm0 = vcmask 130048   ;;  %v2572_v46 = vmov 0.0  }
  0x6e   :  { %v141_v1 = vld [vmem:[#allocation3] sm:$0xff]  ;;  %v143_v3 = vld [vmem:[#allocation3 + $0x10] sm:$0xff]  ;;  %2015 = vmatprep.subr.bf16.mxu0 %v2237_v0  ;;  %v144_v5 = vld [vmem:[#allocation3 + $0x18] sm:$0xff]  ;;  %vm2573_vm1 = vmmov 0   ;;  %2025 = vmatprep.subr.bf16.mxu1 %v2572_v46  ;;  %s2574_s26 = smov 32   ;;  %vm306_vm2 = vcmask 261120  }
  0x6f   :  { %v149_v4 = vpack.c.bf16 %v142_v2, %v141_v1  ;;  %v145_v6 = vld [vmem:[#allocation3 + $0x20] sm:$0xff]  ;;  %v146_v7 = vld [vmem:[#allocation3 + $0x28] sm:$0xff]  ;;  %2016 = vmatpush3.bf16.msra.mxu0 %v2237_v0  ;;  %v150_v8 = vpack.c.bf16 %v144_v5, %v143_v3  ;;  %v147_v10 = vld [vmem:[#allocation3 + $0x30] sm:$0xff]  ;;  %2029 = vmatprep.mubr.msk.bf16.mxu1 %vm2573_vm1, %v2572_v46  ;;  %s2575_s15 = smov [#allocation14]  }
  0x70   :  { %v151_v9 = vpack.c.bf16 %v146_v7, %v145_v6  ;;  %v148_v11 = vld [vmem:[#allocation3 + $0x38] sm:$0xff]  ;;  %v1879_v13 = vld [vmem:[%s3082_s3] ss:$0 sm:$0xff]  ;;  %s2571_s3 = smov 96   ;;  %v2747_v45 = vld [vmem:[#allocation8] sm:$0xff]   ;;  %2041 = vmatprep.subr.bf16.mxu0 %v2572_v46  ;;  %s1866_s2 = sshll.u32 %s2575_s15, 4  ;;  %s1867_s2 = int_to_ptr.vmem [resolvable:$true] %s1866_s2 }
  0x71   :  { %2017 = vmatprep.mubr.msk.bf16.mxu0 %vm165_vm0, %v149_v4  ;;  %v152_v12 = vpack.c.bf16 %v148_v11, %v147_v10  ;;  %v2753_v47 = vld [vmem:[#allocation8 + $0x8] sm:$0xff]   ;;  %v2762_v49 = vld [vmem:[#allocation9] sm:$0xff]   ;;  %v2765_v50 = vld [vmem:[#allocation9 + $0x8] sm:$0xff]   ;;  %s2529_s16 = scalar_lea.vmem %s1867_s2, 128  ;;  %p2534_p7 = scmp.lt.s32.totalorder %s1867_s2, %s1867_s2 }
  0x72   :  { %2018 = vmatmul.mubr.msk.bf16.vlgmr.msra.gmra.mrb[0].mxu0 %vm165_vm0, %v150_v8  ;;  %2026 = vmatpush3.bf16.msra.mxu1 %v2762_v49  ;;  %v2786_v2 = vld [vmem:[%s3085_s6] ss:$0 sm:$0xff]  ;;  %p2530_p6 = scmp.ne.s32.totalorder %s1867_s2, %s2529_s16  ;;  %p2535_p8 = scmp.lt.s32.totalorder %s2529_s16, %s2529_s16 }
  0x73   :  { %2021 = vmatprep.mubr.msk.bf16.mxu0 %vm165_vm0, %v151_v9  ;;  %2042 = vmatpush3.bf16.msra.mxu0 %v2747_v45 }
  0x74   :  { %2043 = vmatprep.subr.bf16.mxu0 %v2572_v46  ;;  %2027 = vmatprep.subr.bf16.mxu1 %v2572_v46  ;;  %p2536_p9 = por %p2535_p8, %p2534_p7 }
  0x76   :  { %2028 = vmatpush3.bf16.msra.mxu1 %v2765_v50  ;;  %p2537_p10 = pnand %p2536_p9, %p2530_p6 }
  0x77   :  { %2044 = vmatpush3.bf16.msra.mxu0 %v2753_v47  ;;  %2033 = vmatprep.subr.bf16.mxu1 %v2572_v46 }
  0x78   :  { %2057 = vmatprep.subr.bf16.mxu0 %v2572_v46 }
  0x7a   :  { %2022 = vmatmul.mubr.msk.bf16.gmra.mrb[4].mxu0 %vm165_vm0, %v152_v12 }
  0x7b   :  { %2045 = vmatprep.mubr.msk.bf16.mxu0 %vm2573_vm1, %v2572_v46 }
 0x145   :  { %v2019_v14 = vpop.f32.mrb[0].mxu0 }
 0x146   :  { %v2725_v15 = vadd.f32 %v2019_v14, %v1879_v13  ;;  %v212_v16 = vpop.f32.mrb[1].mxu0 }
 0x147   :  { %v213_v17 = vadd.f32 %v1879_v13, %v212_v16  ;;  %v2020_v18 = vpop.f32.mrb[2].mxu0 }
 0x148   :  { %v2727_v19 = vadd.f32 %v2020_v18, %v1879_v13  ;;  %v215_v20 = vpop.f32.mrb[3].mxu0 }
 0x149   :  { %2248 = vtanh.f32 %v213_v17  ;;  %v2729_v21 = vadd.f32 %v1879_v13, %v215_v20  ;;  %v1885_v32 = vmul.f32 -1.442695, %v213_v17 }
 0x14d   :  { %v2023_v22 = vpop.f32.mrb[4].mxu0 }
 0x14e   :  { %v2731_v23 = vadd.f32 %v2023_v22, %v1879_v13  ;;  %v228_v24 = vpop.f32.mrb[5].mxu0 }
 0x14f   :  { %v2733_v25 = vadd.f32 %v1879_v13, %v228_v24  ;;  %v2024_v26 = vpop.f32.mrb[6].mxu0 }
 0x150   :  { %v2735_v27 = vadd.f32 %v2024_v26, %v1879_v13  ;;  %v231_v28 = vpop.f32.mrb[7].mxu0 }
 0x151   :  { %v2737_v29 = vadd.f32 %v1879_v13, %v231_v28 }
 0x152   :  { %2250 = vtanh.f32 %v2735_v27  ;;  %v1886_v33 = vmul.f32 -1.442695, %v2735_v27 }
 0x153   :  { %v2249_v30 = vpop.eup %2248  ;;  %2252 = vpow2.f32 %v1885_v32 }
 0x154   :  { %270 = vrot.lane.b32.xlu0 %v2249_v30, %s2571_s3  ;;  %2254 = vpow2.f32 %v1886_v33 }
 0x15c   :  { %v2251_v31 = vpop.eup %2250 }
 0x15d   :  { %272 = vrot.lane.b32.xlu0 %v2251_v31, %s2571_s3  ;;  %v2253_v34 = vpop.eup %2252 }
 0x15e   :  { %v260_v35 = vadd.f32 1.0, %v2253_v34  ;;  %v2255_v36 = vpop.eup %2254 }
 0x15f   :  { %v261_v37 = vadd.f32 1.0, %v2255_v36 }
 0x160   :  { %2256 = vrcp.f32 %v260_v35 }
 0x161   :  { %2258 = vrcp.f32 %v261_v37 }
 0x16a   :  { %v2257_v38 = vpop.eup %2256 }
 0x16b   :  { %v2259_v41 = vpop.eup %2258 }
 0x1c6   :  { %v271_v39 = vpop.permute.xlu0 %270 }
 0x1c7   :  { %v2743_v40 = vmul.f32 %v2257_v38, %v271_v39 }
 0x1c9   :  { %2260 = vtanh.f32 %v2743_v40 }
 0x1cf   :  { %v273_v42 = vpop.permute.xlu0 %272 }
 0x1d0   :  { %v277_v43 = vmul.f32 %v2259_v41, %v273_v42 }
 0x1d2   :  { %2262 = vtanh.f32 %v277_v43 }
 0x1d3   :  { %v2261_v44 = vpop.eup %2260 }
 0x1d4   :  { %282 = vrot.lane.b32.xlu1 %v2261_v44, %s2562_s23 }
 0x1dc   :  { %v2263_v48 = vpop.eup %2262 }
 0x1dd   :  { %284 = vrot.lane.b32.xlu1 %v2263_v48, %s2562_s23 }
 0x246   :  { %v283_v51 = vpop.permute.xlu1 %282 }
 0x247   :  { %v288_v52 = vmul.f32 %v2257_v38, %v283_v51 }
 0x249   :  { %v459_v53 = vpack.c.bf16 %v288_v52, %v288_v52 }
 0x24b   :  { %461 = vrot.lane.b32.xlu0 %v459_v53, %s2574_s26 }
 0x24f   :  { %v285_v54 = vpop.permute.xlu1 %284 }
 0x250   :  { %v289_v55 = vmul.f32 %v2259_v41, %v285_v54  ;;  %v2243_v41 = vld [vmem:[#allocation12 + $0x8] sm:$0xff]  }
 0x252   :  { %v290_v56 = vpack.c.bf16 %v289_v55, %v288_v52 }
 0x254   :  { %292 = vrot.lane.b32.xlu1 %v290_v56, %s2574_s26 }
 0x2bd   :  { %v462_v57 = vpop.permute.xlu0 %461 }
 0x2be   :  { %2046 = vmatmul.mubr.msk.bf16.vlgmr.msra.gmra.mrb[8].mxu0 %vm306_vm2, %v462_v57  ;;  %v2813_v57 = vld [vmem:[%s3084_s5] sm:$0xff]  }
 0x2bf   :  { %2058 = vmatpush3.bf16.msra.mxu0 %v2762_v49  ;;  %2061 = vmatprep.mubr.msk.bf16.mxu0 %vm2573_vm1, %v2572_v46 }
 0x2c0   :  { %2059 = vmatprep.subr.bf16.mxu0 %v2572_v46 }
 0x2c3   :  { %2060 = vmatpush3.bf16.msra.mxu0 %v2765_v50 }
 0x2c4   :  { %2073 = vmatprep.subr.bf16.mxu0 %v2572_v46 }
 0x2c6   :  { %v293_v58 = vpop.permute.xlu1 %292 }
 0x2c7   :  { %2030 = vmatmul.mubr.msk.bf16.vlgmr.msra.gmra.mrb[0].mxu1 %vm306_vm2, %v293_v58 }
 0x2c8   :  { %2037 = vmatprep.mubr.msk.bf16.mxu1 %vm2573_vm1, %v2572_v46 }
 0x391   :  { %v512_v59 = vpop.f32.mrb[8].mxu0 }
 0x392   :  { %v518_v60 = vadd.f32 %v512_v59, %v2729_v21  ;;  %v2047_v61 = vpop.f32.mrb[9].mxu0  ;;  %v2820_v59 = vld [vmem:[%s3084_s5 + $0x8] sm:$0xff]  }
 0x393   :  { %v515_v62 = vpop.f32.mrb[10].mxu0 }
 0x394   :  { %2264 = vtanh.f32 %v518_v60  ;;  %v2048_v63 = vpop.f32.mrb[11].mxu0  ;;  %v1899_v10 = vmul.f32 -1.442695, %v518_v60 }
 0x39a   :  { %v344_v0 = vpop.f32.mrb[0].mxu1 }
 0x39b   :  { %v2031_v1 = vpop.f32.mrb[1].mxu1  ;;  %v345_v7 = vadd.f32 %v2786_v2, %v344_v0 }
 0x39c   :  { %v347_v3 = vpop.f32.mrb[2].mxu1 }
 0x39d   :  { %v348_v4 = vadd.f32 %v2786_v2, %v347_v3  ;;  %v2032_v5 = vpop.f32.mrb[3].mxu1  ;;  %v1890_v13 = vmul.f32 -1.442695, %v345_v7 }
 0x39e   :  { %v2265_v6 = vpop.eup %2264 }
 0x39f   :  { %532 = vrot.lane.b32.xlu0 %v2265_v6, %s2571_s3  ;;  %2266 = vtanh.f32 %v348_v4  ;;  %v1891_v11 = vmul.f32 -1.442695, %v348_v4 }
 0x3a0   :  { %2268 = vtanh.f32 %v345_v7 }
 0x3a1   :  { %2270 = vpow2.f32 %v1899_v10 }
 0x3a2   :  { %2272 = vpow2.f32 %v1891_v11 }
 0x3a3   :  { %527 = vrot.lane.b32.xlu0 %v2743_v40, %s2571_s3  ;;  %2274 = vpow2.f32 %v1890_v13  ;;  %v2242_v40 = vld [vmem:[#allocation12] sm:$0xff]  }
 0x3a4   :  { %2034 = vmatpush3.bf16.msra.mxu1 %v2242_v40 }
 0x3a5   :  { %2035 = vmatprep.subr.bf16.mxu1 %v2572_v46 }
 0x3a8   :  { %2036 = vmatpush3.bf16.msra.mxu1 %v2243_v41 }
 0x3a9   :  { %v2267_v8 = vpop.eup %2266  ;;  %2049 = vmatprep.subr.bf16.mxu1 %v2572_v46 }
 0x3aa   :  { %369 = vrot.lane.b32.xlu1 %v2267_v8, %s2571_s3  ;;  %v2269_v9 = vpop.eup %2268 }
 0x3ab   :  { %v2271_v12 = vpop.eup %2270 }
 0x3ac   :  { %v522_v14 = vadd.f32 1.0, %v2271_v12  ;;  %v2273_v16 = vpop.eup %2272 }
 0x3ad   :  { %v358_v17 = vadd.f32 1.0, %v2273_v16  ;;  %v2275_v18 = vpop.eup %2274 }
 0x3ae   :  { %367 = vrot.lane.b32.xlu1 %v2269_v9, %s2571_s3  ;;  %2276 = vrcp.f32 %v522_v14  ;;  %v357_v24 = vadd.f32 1.0, %v2275_v18 }
 0x3af   :  { %2278 = vrcp.f32 %v358_v17 }
 0x3b0   :  { %2280 = vrcp.f32 %v357_v24 }
 0x3b8   :  { %v2277_v20 = vpop.eup %2276 }
 0x3b9   :  { %v2279_v26 = vpop.eup %2278 }
 0x3ba   :  { %v2281_v31 = vpop.eup %2280 }
 0x411   :  { %v533_v21 = vpop.permute.xlu0 %532 }
 0x412   :  { %v535_v22 = vmul.f32 %v2277_v20, %v533_v21 }
 0x414   :  { %537 = vrot.lane.b32.xlu0 %v535_v22, %s2571_s3 }
 0x415   :  { %v528_v36 = vpop.permute.xlu0 %527 }
 0x416   :  { %v530_v37 = vmul.f32 %v2277_v20, %v528_v36 }
 0x41c   :  { %v370_v28 = vpop.permute.xlu1 %369 }
 0x41d   :  { %v374_v30 = vmul.f32 %v2279_v26, %v370_v28 }
 0x41f   :  { %2282 = vtanh.f32 %v374_v30 }
 0x420   :  { %v368_v32 = vpop.permute.xlu1 %367 }
 0x421   :  { %v2796_v33 = vmul.f32 %v2281_v31, %v368_v32 }
 0x423   :  { %2284 = vtanh.f32 %v2796_v33 }
 0x429   :  { %v2283_v34 = vpop.eup %2282 }
 0x42a   :  { %381 = vrot.lane.b32.xlu1 %v2283_v34, %s2562_s23 }
 0x42d   :  { %v2285_v35 = vpop.eup %2284 }
 0x42e   :  { %379 = vrot.lane.b32.xlu0 %v2285_v35, %s2562_s23 }
 0x486   :  { %v538_v38 = vpop.permute.xlu0 %537 }
 0x487   :  { %v2801_v39 = vadd.f32 %v538_v38, %v530_v37 }
 0x489   :  { %2286 = vtanh.f32 %v2801_v39 }
 0x493   :  { %v2287_v42 = vpop.eup %2286 }
 0x494   :  { %543 = vrot.lane.b32.xlu1 %v2287_v42, %s2571_s3 }
 0x49c   :  { %v382_v43 = vpop.permute.xlu1 %381 }
 0x49d   :  { %v386_v44 = vmul.f32 %v2279_v26, %v382_v43 }
 0x49f   :  { %v391_v48 = vpack.c.bf16 %v386_v44, %v386_v44 }
 0x4a0   :  { %v380_v51 = vpop.permute.xlu0 %379 }
 0x4a1   :  { %v385_v52 = vmul.f32 %v2281_v31, %v380_v51  ;;  %400 = vrot.lane.b32.xlu0 %v391_v48, %s2574_s26 }
 0x4a3   :  { %v548_v53 = vpack.c.bf16 %v385_v52, %v385_v52 }
 0x4a5   :  { %550 = vrot.lane.b32.xlu1 %v548_v53, %s2574_s26 }
 0x506   :  { %v544_v54 = vpop.permute.xlu1 %543 }
 0x507   :  { %v546_v55 = vmul.f32 %v2277_v20, %v544_v54 }
 0x509   :  { %v547_v56 = vpack.c.bf16 %v546_v55, %v546_v55 }
 0x50b   :  { %608 = vrot.lane.b32.xlu0 %v547_v56, %s2574_s26 }
 0x513   :  { %v401_v58 = vpop.permute.xlu0 %400 }
 0x514   :  { %2038 = vmatmul.mubr.msk.bf16.vlgmr.msra.gmra.mrb[4].mxu1 %vm306_vm2, %v401_v58 }
 0x515   :  { %2050 = vmatpush3.bf16.msra.mxu1 %v2813_v57  ;;  %2053 = vmatprep.mubr.msk.bf16.mxu1 %vm2573_vm1, %v2572_v46 }
 0x516   :  { %2051 = vmatprep.subr.bf16.mxu1 %v2572_v46 }
 0x517   :  { %v551_v60 = vpop.permute.xlu1 %550 }
 0x519   :  { %2052 = vmatpush3.bf16.msra.mxu1 %v2820_v59 }
 0x51a   :  { %2065 = vmatprep.subr.bf16.mxu1 %v2572_v46 }
 0x51c   :  { %2054 = vmatmul.mubr.msk.bf16.vlgmr.msra.gmra.mrb[8].mxu1 %vm306_vm2, %v551_v60 }
 0x51d   :  { %2066 = vmatpush3.bf16.msra.mxu1 %v2747_v45  ;;  %2069 = vmatprep.mubr.msk.bf16.mxu1 %vm2573_vm1, %v2572_v46 }
 0x51e   :  { %2067 = vmatprep.subr.bf16.mxu1 %v2572_v46 }
 0x521   :  { %2068 = vmatpush3.bf16.msra.mxu1 %v2753_v47 }
 0x522   :  { %2081 = vmatprep.subr.bf16.mxu1 %v2572_v46 }
 0x57d   :  { %v609_v61 = vpop.permute.xlu0 %608 }
 0x57e   :  { %2062 = vmatmul.mubr.msk.bf16.vlgmr.msra.gmra.mrb[12].mxu0 %vm306_vm2, %v609_v61  ;;  %2070 = vmatmul.mubr.msk.bf16.vlgmr.msra.gmra.mrb[12].mxu1 %vm306_vm2, %v609_v61 }
 0x57f   :  { %2082 = vmatpush3.bf16.msra.mxu1 %v2762_v49  ;;  %2074 = vmatpush3.bf16.msra.mxu0 %v2813_v57 }
 0x580   :  { %2083 = vmatprep.subr.bf16.mxu1 %v2572_v46  ;;  %2075 = vmatprep.subr.bf16.mxu0 %v2572_v46 }
 0x581   :  { %2085 = vmatprep.mubr.msk.bf16.mxu1 %vm2573_vm1, %v2572_v46  ;;  %2077 = vmatprep.mubr.msk.bf16.mxu0 %vm2573_vm1, %v2572_v46 }
 0x583   :  { %2084 = vmatpush3.bf16.msra.mxu1 %v2765_v50  ;;  %2076 = vmatpush3.bf16.msra.mxu0 %v2820_v59 }
 0x584   :  { %2089 = vmatprep.subr.bf16.mxu0 %v2572_v46  ;;  %2097 = vmatprep.subr.bf16.mxu1 %v2572_v46 }
 0x5ef   :  { %v601_v62 = vpop.f32.mrb[8].mxu1 }
 0x5f0   :  { %v2055_v63 = vpop.f32.mrb[9].mxu1 }
 0x5f1   :  { %v604_v0 = vpop.f32.mrb[10].mxu1 }
 0x5f2   :  { %v2056_v1 = vpop.f32.mrb[11].mxu1 }
 0x651   :  { %v647_v3 = vpop.f32.mrb[12].mxu0  ;;  %v718_v4 = vpop.f32.mrb[12].mxu1 }
 0x652   :  { %v648_v5 = vadd.f32 %v647_v3, %v601_v62  ;;  %v724_v6 = vadd.f32 %v718_v4, %v2725_v15  ;;  %v2063_v7 = vpop.f32.mrb[13].mxu0  ;;  %v2071_v8 = vpop.f32.mrb[13].mxu1 }
 0x653   :  { %v650_v9 = vpop.f32.mrb[14].mxu0  ;;  %v721_v10 = vpop.f32.mrb[14].mxu1 }
 0x654   :  { %v653_v11 = vadd.f32 %v2786_v2, %v648_v5  ;;  %2288 = vtanh.f32 %v724_v6  ;;  %v2064_v12 = vpop.f32.mrb[15].mxu0  ;;  %v2072_v13 = vpop.f32.mrb[15].mxu1  ;;  %v1906_v15 = vmul.f32 -1.442695, %v724_v6 }
 0x656   :  { %2290 = vtanh.f32 %v653_v11  ;;  %v1904_v17 = vmul.f32 -1.442695, %v653_v11 }
 0x657   :  { %2292 = vpow2.f32 %v1906_v15 }
 0x658   :  { %2294 = vpow2.f32 %v1904_v17 }
 0x65e   :  { %v2289_v14 = vpop.eup %2288 }
 0x65f   :  { %734 = vrot.lane.b32.xlu0 %v2289_v14, %s2571_s3 }
 0x660   :  { %v2291_v16 = vpop.eup %2290 }
 0x661   :  { %667 = vrot.lane.b32.xlu1 %v2291_v16, %s2571_s3  ;;  %v2293_v18 = vpop.eup %2292 }
 0x662   :  { %v2295_v20 = vpop.eup %2294  ;;  %v728_v21 = vadd.f32 1.0, %v2293_v18 }
 0x663   :  { %v657_v22 = vadd.f32 1.0, %v2295_v20 }
 0x664   :  { %2296 = vrcp.f32 %v728_v21 }
 0x665   :  { %662 = vrot.lane.b32.xlu1 %v2796_v33, %s2571_s3  ;;  %2298 = vrcp.f32 %v657_v22 }
 0x66e   :  { %v2297_v24 = vpop.eup %2296 }
 0x66f   :  { %v2299_v30 = vpop.eup %2298  ;;  %v732_v34 = vmul.f32 %v2297_v24, %v2801_v39 }
 0x6d1   :  { %v735_v26 = vpop.permute.xlu0 %734 }
 0x6d2   :  { %v737_v28 = vmul.f32 %v2297_v24, %v735_v26 }
 0x6d3   :  { %v668_v31 = vpop.permute.xlu1 %667 }
 0x6d4   :  { %v670_v32 = vmul.f32 %v2299_v30, %v668_v31  ;;  %739 = vrot.lane.b32.xlu1 %v737_v28, %s2571_s3 }
 0x6d6   :  { %672 = vrot.lane.b32.xlu0 %v670_v32, %s2571_s3 }
 0x6d7   :  { %v663_v33 = vpop.permute.xlu1 %662 }
 0x6d8   :  { %v665_v36 = vmul.f32 %v2299_v30, %v663_v33 }
 0x746   :  { %v740_v35 = vpop.permute.xlu1 %739 }
 0x747   :  { %v2857_v37 = vadd.f32 %v740_v35, %v732_v34 }
 0x748   :  { %v673_v38 = vpop.permute.xlu0 %672 }
 0x749   :  { %2300 = vtanh.f32 %v2857_v37  ;;  %v2860_v40 = vadd.f32 %v673_v38, %v665_v36 }
 0x74b   :  { %2302 = vtanh.f32 %v2860_v40 }
 0x753   :  { %v2301_v41 = vpop.eup %2300 }
 0x754   :  { %745 = vrot.lane.b32.xlu1 %v2301_v41, %s2571_s3 }
 0x755   :  { %v2303_v42 = vpop.eup %2302 }
 0x756   :  { %678 = vrot.lane.b32.xlu0 %v2303_v42, %s2571_s3 }
 0x7c6   :  { %v746_v43 = vpop.permute.xlu1 %745 }
 0x7c7   :  { %v748_v44 = vmul.f32 %v2297_v24, %v746_v43 }
 0x7c8   :  { %v679_v39 = vpop.permute.xlu0 %678 }
 0x7c9   :  { %v749_v48 = vpack.c.bf16 %v748_v44, %v748_v44  ;;  %v681_v51 = vmul.f32 %v2299_v30, %v679_v39 }
 0x7cb   :  { %v750_v52 = vpack.c.bf16 %v681_v51, %v681_v51  ;;  %798 = vrot.lane.b32.xlu1 %v749_v48, %s2574_s26 }
 0x7cd   :  { %752 = vrot.lane.b32.xlu0 %v750_v52, %s2574_s26 }
 0x83d   :  { %v799_v53 = vpop.permute.xlu1 %798 }
 0x83e   :  { %2086 = vmatmul.mubr.msk.bf16.vlgmr.msra.gmra.mrb[16].mxu1 %vm306_vm2, %v799_v53 }
 0x83f   :  { %v753_v54 = vpop.permute.xlu0 %752  ;;  %2098 = vmatpush3.bf16.msra.mxu1 %v2813_v57  ;;  %2101 = vmatprep.mubr.msk.bf16.mxu1 %vm2573_vm1, %v2572_v46 }
 0x840   :  { %2078 = vmatmul.mubr.msk.bf16.vlgmr.msra.gmra.mrb[16].mxu0 %vm306_vm2, %v753_v54  ;;  %2099 = vmatprep.subr.bf16.mxu1 %v2572_v46 }
 0x841   :  { %2090 = vmatpush3.bf16.msra.mxu0 %v2747_v45  ;;  %2093 = vmatprep.mubr.msk.bf16.mxu0 %vm2573_vm1, %v2572_v46 }
 0x842   :  { %2091 = vmatprep.subr.bf16.mxu0 %v2572_v46 }
 0x843   :  { %2100 = vmatpush3.bf16.msra.mxu1 %v2820_v59 }
 0x844   :  { %2113 = vmatprep.subr.bf16.mxu1 %v2572_v46 }
 0x845   :  { %2092 = vmatpush3.bf16.msra.mxu0 %v2753_v47 }
 0x846   :  { %2105 = vmatprep.subr.bf16.mxu0 %v2572_v46 }
 0x848   :  { %2094 = vmatmul.mubr.msk.bf16.vlgmr.msra.gmra.mrb[20].mxu0 %vm306_vm2, %v799_v53 }
 0x849   :  { %2106 = vmatpush3.bf16.msra.mxu0 %v2762_v49  ;;  %2109 = vmatprep.mubr.msk.bf16.mxu0 %vm2573_vm1, %v2572_v46 }
 0x84a   :  { %2107 = vmatprep.subr.bf16.mxu0 %v2572_v46 }
 0x84d   :  { %2108 = vmatpush3.bf16.msra.mxu0 %v2765_v50 }
 0x84e   :  { %2121 = vmatprep.subr.bf16.mxu0 %v2572_v46 }
 0x911   :  { %v837_v55 = vpop.f32.mrb[16].mxu1 }
 0x912   :  { %v2087_v56 = vpop.f32.mrb[17].mxu1 }
 0x913   :  { %v791_v58 = vpop.f32.mrb[16].mxu0  ;;  %v840_v60 = vpop.f32.mrb[18].mxu1 }
 0x914   :  { %v838_v61 = vadd.f32 %v837_v55, %v791_v58  ;;  %v2079_v62 = vpop.f32.mrb[17].mxu0  ;;  %v2088_v63 = vpop.f32.mrb[19].mxu1 }
 0x915   :  { %v794_v0 = vpop.f32.mrb[18].mxu0 }
 0x916   :  { %v843_v1 = vadd.f32 %v2786_v2, %v838_v61  ;;  %v2080_v3 = vpop.f32.mrb[19].mxu0 }
 0x918   :  { %2304 = vtanh.f32 %v843_v1  ;;  %v1909_v11 = vmul.f32 -1.442695, %v843_v1 }
 0x91b   :  { %v904_v4 = vpop.f32.mrb[20].mxu0 }
 0x91c   :  { %v910_v5 = vadd.f32 %v904_v4, %v2727_v19  ;;  %v2095_v6 = vpop.f32.mrb[21].mxu0 }
 0x91d   :  { %v907_v7 = vpop.f32.mrb[22].mxu0 }
 0x91e   :  { %2306 = vtanh.f32 %v910_v5  ;;  %v2096_v8 = vpop.f32.mrb[23].mxu0  ;;  %v1911_v12 = vmul.f32 -1.442695, %v910_v5 }
 0x91f   :  { %2308 = vpow2.f32 %v1909_v11 }
 0x920   :  { %2310 = vpow2.f32 %v1911_v12 }
 0x922   :  { %v2305_v9 = vpop.eup %2304 }
 0x923   :  { %853 = vrot.lane.b32.xlu0 %v2305_v9, %s2571_s3 }
 0x928   :  { %v2307_v10 = vpop.eup %2306 }
 0x929   :  { %920 = vrot.lane.b32.xlu1 %v2307_v10, %s2571_s3  ;;  %v2309_v13 = vpop.eup %2308 }
 0x92a   :  { %v847_v14 = vadd.f32 1.0, %v2309_v13  ;;  %v2311_v16 = vpop.eup %2310 }
 0x92b   :  { %v914_v15 = vadd.f32 1.0, %v2311_v16 }
 0x92c   :  { %2312 = vrcp.f32 %v847_v14 }
 0x92d   :  { %2314 = vrcp.f32 %v914_v15 }
 0x936   :  { %v2313_v19 = vpop.eup %2312 }
 0x937   :  { %v2315_v20 = vpop.eup %2314  ;;  %v851_v24 = vmul.f32 %v2313_v19, %v2860_v40 }
 0x938   :  { %v918_v30 = vmul.f32 %v2315_v20, %v2857_v37 }
 0x995   :  { %v854_v17 = vpop.permute.xlu0 %853 }
 0x996   :  { %v856_v18 = vmul.f32 %v2313_v19, %v854_v17 }
 0x998   :  { %858 = vrot.lane.b32.xlu0 %v856_v18, %s2571_s3 }
 0x99b   :  { %v921_v21 = vpop.permute.xlu1 %920 }
 0x99c   :  { %v923_v22 = vmul.f32 %v2315_v20, %v921_v21 }
 0x99e   :  { %925 = vrot.lane.b32.xlu1 %v923_v22, %s2571_s3 }
 0xa0a   :  { %v859_v26 = vpop.permute.xlu0 %858 }
 0xa0b   :  { %v2895_v28 = vadd.f32 %v859_v26, %v851_v24 }
 0xa0d   :  { %2316 = vtanh.f32 %v2895_v28 }
 0xa10   :  { %v926_v31 = vpop.permute.xlu1 %925 }
 0xa11   :  { %v2899_v32 = vadd.f32 %v926_v31, %v918_v30 }
 0xa13   :  { %2318 = vtanh.f32 %v2899_v32 }
 0xa17   :  { %v2317_v33 = vpop.eup %2316 }
 0xa18   :  { %864 = vrot.lane.b32.xlu0 %v2317_v33, %s2571_s3 }
 0xa1d   :  { %v2319_v34 = vpop.eup %2318 }
 0xa1e   :  { %931 = vrot.lane.b32.xlu1 %v2319_v34, %s2571_s3 }
 0xa8a   :  { %v865_v35 = vpop.permute.xlu0 %864 }
 0xa8b   :  { %v867_v36 = vmul.f32 %v2313_v19, %v865_v35 }
 0xa8d   :  { %v936_v38 = vpack.c.bf16 %v867_v36, %v867_v36 }
 0xa8f   :  { %938 = vrot.lane.b32.xlu0 %v936_v38, %s2574_s26 }
 0xa90   :  { %v932_v40 = vpop.permute.xlu1 %931 }
 0xa91   :  { %v934_v41 = vmul.f32 %v2315_v20, %v932_v40 }
 0xa93   :  { %v935_v42 = vpack.c.bf16 %v934_v41, %v934_v41 }
 0xa95   :  { %984 = vrot.lane.b32.xlu1 %v935_v42, %s2574_s26 }
 0xb01   :  { %v939_v37 = vpop.permute.xlu0 %938 }
 0xb02   :  { %2102 = vmatmul.mubr.msk.bf16.vlgmr.msra.gmra.mrb[20].mxu1 %vm306_vm2, %v939_v37 }
 0xb03   :  { %2114 = vmatpush3.bf16.msra.mxu1 %v2747_v45  ;;  %2117 = vmatprep.mubr.msk.bf16.mxu1 %vm2573_vm1, %v2572_v46 }
 0xb04   :  { %2115 = vmatprep.subr.bf16.mxu1 %v2572_v46 }
 0xb07   :  { %v985_v43 = vpop.permute.xlu1 %984  ;;  %2116 = vmatpush3.bf16.msra.mxu1 %v2753_v47 }
 0xb08   :  { %2110 = vmatmul.mubr.msk.bf16.vlgmr.msra.gmra.mrb[24].mxu0 %vm306_vm2, %v985_v43  ;;  %2129 = vmatprep.subr.bf16.mxu1 %v2572_v46 }
 0xb09   :  { %2122 = vmatpush3.bf16.msra.mxu0 %v2813_v57  ;;  %2125 = vmatprep.mubr.msk.bf16.mxu0 %vm2573_vm1, %v2572_v46 }
 0xb0a   :  { %2118 = vmatmul.mubr.msk.bf16.vlgmr.msra.gmra.mrb[24].mxu1 %vm306_vm2, %v985_v43  ;;  %2123 = vmatprep.subr.bf16.mxu0 %v2572_v46 }
 0xb0b   :  { %2130 = vmatpush3.bf16.msra.mxu1 %v2762_v49  ;;  %2133 = vmatprep.mubr.msk.bf16.mxu1 %vm2573_vm1, %v2572_v46 }
 0xb0c   :  { %2131 = vmatprep.subr.bf16.mxu1 %v2572_v46 }
 0xb0d   :  { %2124 = vmatpush3.bf16.msra.mxu0 %v2820_v59 }
 0xb0e   :  { %2137 = vmatprep.subr.bf16.mxu0 %v2572_v46 }
 0xb0f   :  { %2132 = vmatpush3.bf16.msra.mxu1 %v2765_v50 }
 0xb10   :  { %2145 = vmatprep.subr.bf16.mxu1 %v2572_v46 }
 0xbd5   :  { %v977_v44 = vpop.f32.mrb[20].mxu1 }
 0xbd6   :  { %v2103_v39 = vpop.f32.mrb[21].mxu1 }
 0xbd7   :  { %v980_v48 = vpop.f32.mrb[22].mxu1 }
 0xbd8   :  { %v2104_v51 = vpop.f32.mrb[23].mxu1 }
 0xbdb   :  { %v1023_v52 = vpop.f32.mrb[24].mxu0 }
 0xbdc   :  { %v1024_v53 = vadd.f32 %v1023_v52, %v977_v44  ;;  %v2111_v54 = vpop.f32.mrb[25].mxu0 }
 0xbdd   :  { %v1026_v55 = vpop.f32.mrb[26].mxu0  ;;  %v1090_v56 = vpop.f32.mrb[24].mxu1 }
 0xbde   :  { %v1029_v58 = vadd.f32 %v2786_v2, %v1024_v53  ;;  %v1096_v60 = vadd.f32 %v1090_v56, %v2733_v25  ;;  %v2112_v61 = vpop.f32.mrb[27].mxu0  ;;  %v2119_v62 = vpop.f32.mrb[25].mxu1 }
 0xbdf   :  { %v1093_v63 = vpop.f32.mrb[26].mxu1 }
 0xbe0   :  { %2320 = vtanh.f32 %v1029_v58  ;;  %v2120_v0 = vpop.f32.mrb[27].mxu1  ;;  %v1914_v4 = vmul.f32 -1.442695, %v1029_v58  ;;  %v1916_v5 = vmul.f32 -1.442695, %v1096_v60 }
 0xbe1   :  { %2322 = vtanh.f32 %v1096_v60 }
 0xbe2   :  { %2324 = vpow2.f32 %v1914_v4 }
 0xbe3   :  { %2326 = vpow2.f32 %v1916_v5 }
 0xbea   :  { %v2321_v1 = vpop.eup %2320 }
 0xbeb   :  { %v2323_v3 = vpop.eup %2322  ;;  %1039 = vrot.lane.b32.xlu0 %v2321_v1, %s2571_s3 }
 0xbec   :  { %1106 = vrot.lane.b32.xlu1 %v2323_v3, %s2571_s3  ;;  %v2325_v6 = vpop.eup %2324 }
 0xbed   :  { %v2327_v7 = vpop.eup %2326  ;;  %v1033_v8 = vadd.f32 1.0, %v2325_v6 }
 0xbee   :  { %v1100_v25 = vadd.f32 1.0, %v2327_v7 }
 0xbef   :  { %2328 = vrcp.f32 %v1033_v8 }
 0xbf0   :  { %2330 = vrcp.f32 %v1100_v25 }
 0xbf9   :  { %v2329_v9 = vpop.eup %2328 }
 0xbfa   :  { %v2331_v11 = vpop.eup %2330  ;;  %v1037_v16 = vmul.f32 %v2329_v9, %v2895_v28 }
 0xbfb   :  { %v1104_v19 = vmul.f32 %v2331_v11, %v2899_v32 }
 0xc5d   :  { %v1040_v10 = vpop.permute.xlu0 %1039 }
 0xc5e   :  { %v1042_v12 = vmul.f32 %v2329_v9, %v1040_v10  ;;  %v1107_v13 = vpop.permute.xlu1 %1106 }
 0xc5f   :  { %v1109_v14 = vmul.f32 %v2331_v11, %v1107_v13 }
 0xc60   :  { %1044 = vrot.lane.b32.xlu0 %v1042_v12, %s2571_s3 }
 0xc61   :  { %1111 = vrot.lane.b32.xlu1 %v1109_v14, %s2571_s3 }
 0xcd2   :  { %v1045_v15 = vpop.permute.xlu0 %1044 }
 0xcd3   :  { %v2935_v17 = vadd.f32 %v1045_v15, %v1037_v16  ;;  %v1112_v18 = vpop.permute.xlu1 %1111 }
 0xcd4   :  { %v2937_v20 = vadd.f32 %v1112_v18, %v1104_v19 }
 0xcd5   :  { %2332 = vtanh.f32 %v2935_v17 }
 0xcd6   :  { %2334 = vtanh.f32 %v2937_v20 }
 0xcdf   :  { %v2333_v21 = vpop.eup %2332 }
 0xce0   :  { %v2335_v22 = vpop.eup %2334  ;;  %1050 = vrot.lane.b32.xlu0 %v2333_v21, %s2571_s3 }
 0xce1   :  { %1117 = vrot.lane.b32.xlu1 %v2335_v22, %s2571_s3 }
 0xd52   :  { %v1051_v24 = vpop.permute.xlu0 %1050 }
 0xd53   :  { %v1053_v26 = vmul.f32 %v2329_v9, %v1051_v24  ;;  %v1118_v28 = vpop.permute.xlu1 %1117 }
 0xd54   :  { %v1120_v30 = vmul.f32 %v2331_v11, %v1118_v28 }
 0xd55   :  { %v1122_v31 = vpack.c.bf16 %v1053_v26, %v1053_v26 }
 0xd56   :  { %v1121_v32 = vpack.c.bf16 %v1120_v30, %v1120_v30 }
 0xd57   :  { %1124 = vrot.lane.b32.xlu0 %v1122_v31, %s2574_s26 }
 0xd58   :  { %1170 = vrot.lane.b32.xlu1 %v1121_v32, %s2574_s26 }
 0xdc9   :  { %v1125_v33 = vpop.permute.xlu0 %1124 }
 0xdca   :  { %v1171_v34 = vpop.permute.xlu1 %1170  ;;  %2126 = vmatmul.mubr.msk.bf16.vlgmr.msra.gmra.mrb[28].mxu0 %vm306_vm2, %v1125_v33 }
 0xdcb   :  { %2134 = vmatmul.mubr.msk.bf16.vlgmr.msra.gmra.mrb[28].mxu1 %vm306_vm2, %v1171_v34  ;;  %2138 = vmatpush3.bf16.msra.mxu0 %v2747_v45 }
 0xdcc   :  { %2139 = vmatprep.subr.bf16.mxu0 %v2572_v46  ;;  %2141 = vmatprep.mubr.msk.bf16.mxu0 %vm2573_vm1, %v2572_v46 }
 0xdcd   :  { %2146 = vmatpush3.bf16.msra.mxu1 %v2813_v57  ;;  %2149 = vmatprep.mubr.msk.bf16.mxu1 %vm2573_vm1, %v2572_v46 }
 0xdce   :  { %2147 = vmatprep.subr.bf16.mxu1 %v2572_v46 }
 0xdcf   :  { %2140 = vmatpush3.bf16.msra.mxu0 %v2753_v47 }
 0xdd0   :  { %2153 = vmatprep.subr.bf16.mxu0 %v2572_v46 }
 0xdd1   :  { %2148 = vmatpush3.bf16.msra.mxu1 %v2820_v59 }
 0xdd2   :  { %2142 = vmatmul.mubr.msk.bf16.vlgmr.msra.gmra.mrb[32].mxu0 %vm306_vm2, %v1171_v34  ;;  %2161 = vmatprep.subr.bf16.mxu1 %v2572_v46 }
 0xdd3   :  { %2154 = vmatpush3.bf16.msra.mxu0 %v2762_v49  ;;  %2157 = vmatprep.mubr.msk.bf16.mxu0 %vm2573_vm1, %v2572_v46 }
 0xdd4   :  { %2155 = vmatprep.subr.bf16.mxu0 %v2572_v46 }
 0xdd7   :  { %2156 = vmatpush3.bf16.msra.mxu0 %v2765_v50 }
 0xdd8   :  { %2169 = vmatprep.subr.bf16.mxu0 %v2572_v46 }
 0xe9d   :  { %v1163_v35 = vpop.f32.mrb[28].mxu0 }
 0xe9e   :  { %v1209_v36 = vpop.f32.mrb[28].mxu1  ;;  %v2127_v38 = vpop.f32.mrb[29].mxu0 }
 0xe9f   :  { %v1210_v40 = vadd.f32 %v1209_v36, %v1163_v35  ;;  %v2135_v41 = vpop.f32.mrb[29].mxu1  ;;  %v1166_v42 = vpop.f32.mrb[30].mxu0 }
 0xea0   :  { %v1212_v37 = vpop.f32.mrb[30].mxu1  ;;  %v2128_v43 = vpop.f32.mrb[31].mxu0 }
 0xea1   :  { %v1215_v44 = vadd.f32 %v2786_v2, %v1210_v40  ;;  %v2136_v39 = vpop.f32.mrb[31].mxu1 }
 0xea3   :  { %2336 = vtanh.f32 %v1215_v44  ;;  %v1919_v58 = vmul.f32 -1.442695, %v1215_v44 }
 0xea5   :  { %v1276_v48 = vpop.f32.mrb[32].mxu0 }
 0xea6   :  { %v1282_v51 = vadd.f32 %v1276_v48, %v2737_v29  ;;  %v2143_v52 = vpop.f32.mrb[33].mxu0 }
 0xea7   :  { %v1279_v53 = vpop.f32.mrb[34].mxu0 }
 0xea8   :  { %2338 = vtanh.f32 %v1282_v51  ;;  %v2144_v54 = vpop.f32.mrb[35].mxu0  ;;  %v1921_v60 = vmul.f32 -1.442695, %v1282_v51 }
 0xea9   :  { %2340 = vpow2.f32 %v1919_v58 }
 0xeaa   :  { %2342 = vpow2.f32 %v1921_v60 }
 0xead   :  { %v2337_v55 = vpop.eup %2336 }
 0xeae   :  { %1225 = vrot.lane.b32.xlu0 %v2337_v55, %s2571_s3 }
 0xeb2   :  { %v2339_v56 = vpop.eup %2338 }
 0xeb3   :  { %1292 = vrot.lane.b32.xlu1 %v2339_v56, %s2571_s3  ;;  %v2341_v61 = vpop.eup %2340 }
 0xeb4   :  { %v1219_v62 = vadd.f32 1.0, %v2341_v61  ;;  %v2343_v63 = vpop.eup %2342 }
 0xeb5   :  { %v1286_v0 = vadd.f32 1.0, %v2343_v63 }
 0xeb6   :  { %2344 = vrcp.f32 %v1219_v62 }
 0xeb7   :  { %2346 = vrcp.f32 %v1286_v0 }
 0xec0   :  { %v2345_v29 = vpop.eup %2344 }
 0xec1   :  { %v2347_v4 = vpop.eup %2346  ;;  %v1223_v7 = vmul.f32 %v2345_v29, %v2935_v17 }
 0xec2   :  { %v1290_v9 = vmul.f32 %v2347_v4, %v2937_v20 }
 0xf20   :  { %v1226_v1 = vpop.permute.xlu0 %1225 }
 0xf21   :  { %v1228_v3 = vmul.f32 %v2345_v29, %v1226_v1 }
 0xf23   :  { %1230 = vrot.lane.b32.xlu0 %v1228_v3, %s2571_s3 }
 0xf25   :  { %v1293_v5 = vpop.permute.xlu1 %1292 }
 0xf26   :  { %v1295_v6 = vmul.f32 %v2347_v4, %v1293_v5 }
 0xf28   :  { %1297 = vrot.lane.b32.xlu1 %v1295_v6, %s2571_s3 }
 0xf95   :  { %v1231_v8 = vpop.permute.xlu0 %1230 }
 0xf96   :  { %v2973_v25 = vadd.f32 %v1231_v8, %v1223_v7 }
 0xf98   :  { %2348 = vtanh.f32 %v2973_v25 }
 0xf9a   :  { %v1298_v10 = vpop.permute.xlu1 %1297 }
 0xf9b   :  { %v2977_v11 = vadd.f32 %v1298_v10, %v1290_v9  ;;  %v2393_v9 = vld [vmem:[#allocation8 + $0x8] sm:$0xff]   ;;  %v2394_v10 = vld [vmem:[#allocation9] sm:$0xff]  }
 0xf9d   :  { %2350 = vtanh.f32 %v2977_v11 }
 0xfa2   :  { %v2349_v12 = vpop.eup %2348 }
 0xfa3   :  { %1236 = vrot.lane.b32.xlu0 %v2349_v12, %s2571_s3 }
 0xfa7   :  { %v2351_v13 = vpop.eup %2350 }
 0xfa8   :  { %1303 = vrot.lane.b32.xlu1 %v2351_v13, %s2571_s3 }
0x1015   :  { %v1237_v14 = vpop.permute.xlu0 %1236 }
0x1016   :  { %v1239_v16 = vmul.f32 %v2345_v29, %v1237_v14 }
0x1018   :  { %v1308_v15 = vpack.c.bf16 %v1239_v16, %v1239_v16 }
0x101a   :  { %1310 = vrot.lane.b32.xlu0 %v1308_v15, %s2574_s26  ;;  %v1304_v19 = vpop.permute.xlu1 %1303 }
0x101b   :  { %v1306_v17 = vmul.f32 %v2347_v4, %v1304_v19 }
0x101d   :  { %v1307_v18 = vpack.c.bf16 %v1306_v17, %v1306_v17 }
0x101f   :  { %1356 = vrot.lane.b32.xlu1 %v1307_v18, %s2574_s26 }
0x108c   :  { %v1311_v20 = vpop.permute.xlu0 %1310 }
0x108d   :  { %2150 = vmatmul.mubr.msk.bf16.vlgmr.msra.gmra.mrb[32].mxu1 %vm306_vm2, %v1311_v20 }
0x108e   :  { %2162 = vmatpush3.bf16.msra.mxu1 %v2747_v45  ;;  %2165 = vmatprep.mubr.msk.bf16.mxu1 %vm2573_vm1, %v2572_v46 }
0x108f   :  { %2163 = vmatprep.subr.bf16.mxu1 %v2572_v46 }
0x1091   :  { %v1357_v21 = vpop.permute.xlu1 %1356 }
0x1092   :  { %2164 = vmatpush3.bf16.msra.mxu1 %v2753_v47  ;;  %2158 = vmatmul.mubr.msk.bf16.vlgmr.msra.gmra.mrb[36].mxu0 %vm306_vm2, %v1357_v21 }
0x1093   :  { %2170 = vmatpush3.bf16.msra.mxu0 %v2813_v57  ;;  %2177 = vmatprep.subr.bf16.mxu1 %v2572_v46 }
0x1094   :  { %2171 = vmatprep.subr.bf16.mxu0 %v2572_v46  ;;  %2173 = vmatprep.mubr.msk.bf16.mxu0 %vm2573_vm1, %v2572_v46 }
0x1095   :  { %2166 = vmatmul.mubr.msk.bf16.vlgmr.msra.gmra.mrb[36].mxu1 %vm306_vm2, %v1357_v21 }
0x1096   :  { %2178 = vmatpush3.bf16.msra.mxu1 %v2762_v49  ;;  %2181 = vmatprep.mubr.msk.bf16.mxu1 %vm2573_vm1, %v2572_v46 }
0x1097   :  { %2172 = vmatpush3.bf16.msra.mxu0 %v2820_v59  ;;  %2179 = vmatprep.subr.bf16.mxu1 %v2572_v46 }
0x1098   :  { %2185 = vmatprep.subr.bf16.mxu0 %v2572_v46 }
0x109a   :  { %2180 = vmatpush3.bf16.msra.mxu1 %v2765_v50 }
0x109b   :  { %2193 = vmatprep.subr.bf16.mxu1 %v2572_v46 }
0x1160   :  { %v1349_v45 = vpop.f32.mrb[32].mxu1 }
0x1161   :  { %v2151_v47 = vpop.f32.mrb[33].mxu1 }
0x1162   :  { %v1352_v22 = vpop.f32.mrb[34].mxu1 }
0x1163   :  { %v2152_v24 = vpop.f32.mrb[35].mxu1 }
0x1165   :  { %v1395_v26 = vpop.f32.mrb[36].mxu0 }
0x1166   :  { %v1396_v28 = vadd.f32 %v1395_v26, %v1349_v45  ;;  %v2159_v49 = vpop.f32.mrb[37].mxu0 }
0x1167   :  { %v1398_v30 = vpop.f32.mrb[38].mxu0 }
0x1168   :  { %v1401_v31 = vadd.f32 %v2786_v2, %v1396_v28  ;;  %v1462_v32 = vpop.f32.mrb[36].mxu1  ;;  %v2160_v33 = vpop.f32.mrb[39].mxu0 }
0x1169   :  { %v1468_v34 = vadd.f32 %v1462_v32, %v2731_v23  ;;  %v2167_v35 = vpop.f32.mrb[37].mxu1 }
0x116a   :  { %2352 = vtanh.f32 %v1401_v31  ;;  %v1465_v36 = vpop.f32.mrb[38].mxu1  ;;  %v1924_v41 = vmul.f32 -1.442695, %v1401_v31 }
0x116b   :  { %2354 = vtanh.f32 %v1468_v34  ;;  %v2168_v50 = vpop.f32.mrb[39].mxu1  ;;  %v1926_v42 = vmul.f32 -1.442695, %v1468_v34 }
0x116c   :  { %2356 = vpow2.f32 %v1924_v41 }
0x116d   :  { %2358 = vpow2.f32 %v1926_v42 }
0x1174   :  { %v2353_v38 = vpop.eup %2352 }
0x1175   :  { %v2355_v40 = vpop.eup %2354  ;;  %1411 = vrot.lane.b32.xlu0 %v2353_v38, %s2571_s3 }
0x1176   :  { %1478 = vrot.lane.b32.xlu1 %v2355_v40, %s2571_s3  ;;  %v2357_v37 = vpop.eup %2356 }
0x1177   :  { %v2359_v43 = vpop.eup %2358  ;;  %v1405_v44 = vadd.f32 1.0, %v2357_v37 }
0x1178   :  { %v1472_v39 = vadd.f32 1.0, %v2359_v43 }
0x1179   :  { %2360 = vrcp.f32 %v1405_v44 }
0x117a   :  { %2362 = vrcp.f32 %v1472_v39 }
0x1183   :  { %v2361_v23 = vpop.eup %2360 }
0x1184   :  { %v2363_v51 = vpop.eup %2362  ;;  %v1409_v55 = vmul.f32 %v2361_v23, %v2973_v25  ;;  %v2392_v25 = vld [vmem:[#allocation8] sm:$0xff]  }
0x1185   :  { %v1476_v58 = vmul.f32 %v2363_v51, %v2977_v11 }
0x11e7   :  { %v1412_v48 = vpop.permute.xlu0 %1411 }
0x11e8   :  { %v1414_v52 = vmul.f32 %v2361_v23, %v1412_v48  ;;  %v1479_v53 = vpop.permute.xlu1 %1478 }
0x11e9   :  { %v1481_v54 = vmul.f32 %v2363_v51, %v1479_v53 }
0x11ea   :  { %1416 = vrot.lane.b32.xlu0 %v1414_v52, %s2571_s3 }
0x11eb   :  { %1483 = vrot.lane.b32.xlu1 %v1481_v54, %s2571_s3 }
0x125c   :  { %v1417_v56 = vpop.permute.xlu0 %1416 }
0x125d   :  { %v3013_v60 = vadd.f32 %v1417_v56, %v1409_v55  ;;  %v1484_v61 = vpop.permute.xlu1 %1483 }
0x125e   :  { %v3015_v62 = vadd.f32 %v1484_v61, %v1476_v58 }
0x125f   :  { %2364 = vtanh.f32 %v3013_v60 }
0x1260   :  { %2366 = vtanh.f32 %v3015_v62 }
0x1269   :  { %v2365_v63 = vpop.eup %2364 }
0x126a   :  { %v2367_v0 = vpop.eup %2366  ;;  %1422 = vrot.lane.b32.xlu0 %v2365_v63, %s2571_s3 }
0x126b   :  { %1489 = vrot.lane.b32.xlu1 %v2367_v0, %s2571_s3 }
0x12dc   :  { %v1423_v29 = vpop.permute.xlu0 %1422 }
0x12dd   :  { %v1425_v1 = vmul.f32 %v2361_v23, %v1423_v29  ;;  %v1490_v3 = vpop.permute.xlu1 %1489 }
0x12de   :  { %v1492_v4 = vmul.f32 %v2363_v51, %v1490_v3  ;;  %v2396_v3 = vld [vmem:[%s3085_s6] ss:$0 sm:$0xff] }
0x12df   :  { %v1494_v5 = vpack.c.bf16 %v1425_v1, %v1425_v1 }
0x12e0   :  { %v1493_v6 = vpack.c.bf16 %v1492_v4, %v1492_v4 }
0x12e1   :  { %1496 = vrot.lane.b32.xlu0 %v1494_v5, %s2574_s26 }
0x12e2   :  { %1542 = vrot.lane.b32.xlu1 %v1493_v6, %s2574_s26 }
0x1353   :  { %v1497_v7 = vpop.permute.xlu0 %1496 }
0x1354   :  { %v1543_v8 = vpop.permute.xlu1 %1542  ;;  %2174 = vmatmul.mubr.msk.bf16.vlgmr.msra.gmra.mrb[40].mxu0 %vm306_vm2, %v1497_v7 }
0x1355   :  { %2182 = vmatmul.mubr.msk.bf16.vlgmr.msra.gmra.mrb[40].mxu1 %vm306_vm2, %v1543_v8  ;;  %2186 = vmatpush3.bf16.msra.mxu0 %v2392_v25 }
0x1356   :  { %2187 = vmatprep.subr.bf16.mxu0 %v2572_v46  ;;  %2189 = vmatprep.mubr.msk.bf16.mxu0 %vm2573_vm1, %v2572_v46 }
0x1357   :  { %2194 = vmatpush3.bf16.msra.mxu1 %v2813_v57  ;;  %2197 = vmatprep.mubr.msk.bf16.mxu1 %vm2573_vm1, %v2572_v46  ;;  %v2395_v57 = vld [vmem:[#allocation9 + $0x8] sm:$0xff]  }
0x1358   :  { %2195 = vmatprep.subr.bf16.mxu1 %v2572_v46 }
0x1359   :  { %2188 = vmatpush3.bf16.msra.mxu0 %v2393_v9 }
0x135a   :  { %2201 = vmatprep.subr.bf16.mxu0 %v2572_v46 }
0x135b   :  { %2196 = vmatpush3.bf16.msra.mxu1 %v2820_v59 }
0x135c   :  { %2190 = vmatmul.mubr.msk.bf16.vlgmr.msra.gmra.mrb[44].mxu0 %vm306_vm2, %v1543_v8  ;;  %2209 = vmatprep.subr.bf16.mxu1 %v2572_v46 }
0x135d   :  { %2202 = vmatpush3.bf16.msra.mxu0 %v2394_v10  ;;  %2205 = vmatprep.mubr.msk.bf16.mxu0 %vm2573_vm1, %v2572_v46 }
0x135e   :  { %2203 = vmatprep.subr.bf16.mxu0 %v2572_v46 }
0x1361   :  { %2204 = vmatpush3.bf16.msra.mxu0 %v2395_v57 }
0x1427   :  { %v1535_v11 = vpop.f32.mrb[40].mxu0 }
0x1428   :  { %v1581_v12 = vpop.f32.mrb[40].mxu1  ;;  %v2175_v13 = vpop.f32.mrb[41].mxu0 }
0x1429   :  { %v1582_v14 = vadd.f32 %v1581_v12, %v1535_v11  ;;  %v2183_v16 = vpop.f32.mrb[41].mxu1  ;;  %v1538_v15 = vpop.f32.mrb[42].mxu0 }
0x142a   :  { %v1584_v59 = vpop.f32.mrb[42].mxu1  ;;  %v2176_v19 = vpop.f32.mrb[43].mxu0  ;;  %v2247_v16 = vld [vmem:[#allocation11 + $0x8] sm:$0xff]  }
0x142b   :  { %v1587_v17 = vadd.f32 %v2786_v2, %v1582_v14  ;;  %v2184_v18 = vpop.f32.mrb[43].mxu1  ;;  %v2246_v14 = vld [vmem:[#allocation11] sm:$0xff]  }
0x142d   :  { %2368 = vtanh.f32 %v1587_v17  ;;  %v1929_v28 = vmul.f32 -1.442695, %v1587_v17 }
0x142f   :  { %v1646_v20 = vpop.f32.mrb[44].mxu0 }
0x1430   :  { %v1652_v21 = vadd.f32 %v1646_v20, %v2735_v27  ;;  %v2191_v45 = vpop.f32.mrb[45].mxu0  ;;  %v1892_v20 = vld [vmem:[%s3088_s9] ss:$0 sm:$0xff] }
0x1431   :  { %v1649_v47 = vpop.f32.mrb[46].mxu0 }
0x1432   :  { %2370 = vtanh.f32 %v1652_v21  ;;  %v2192_v22 = vpop.f32.mrb[47].mxu0  ;;  %v1931_v49 = vmul.f32 -1.442695, %v1652_v21 }
0x1433   :  { %2372 = vpow2.f32 %v1929_v28 }
0x1434   :  { %2374 = vpow2.f32 %v1931_v49 }
0x1437   :  { %v2369_v24 = vpop.eup %2368 }
0x1438   :  { %1597 = vrot.lane.b32.xlu0 %v2369_v24, %s2571_s3 }
0x143c   :  { %v2371_v26 = vpop.eup %2370 }
0x143d   :  { %1662 = vrot.lane.b32.xlu1 %v2371_v26, %s2571_s3  ;;  %v2373_v2 = vpop.eup %2372 }
0x143e   :  { %v1591_v30 = vadd.f32 1.0, %v2373_v2  ;;  %v2375_v31 = vpop.eup %2374 }
0x143f   :  { %v1656_v32 = vadd.f32 1.0, %v2375_v31 }
0x1440   :  { %2376 = vrcp.f32 %v1591_v30 }
0x1441   :  { %2378 = vrcp.f32 %v1656_v32 }
0x144a   :  { %v2377_v27 = vpop.eup %2376 }
0x144b   :  { %v2379_v35 = vpop.eup %2378  ;;  %v1595_v38 = vmul.f32 %v2377_v27, %v3013_v60 }
0x144c   :  { %v1660_v42 = vmul.f32 %v2379_v35, %v3015_v62 }
0x14aa   :  { %v1598_v33 = vpop.permute.xlu0 %1597 }
0x14ab   :  { %v1600_v34 = vmul.f32 %v2377_v27, %v1598_v33 }
0x14ad   :  { %1602 = vrot.lane.b32.xlu0 %v1600_v34, %s2571_s3 }
0x14af   :  { %v1663_v36 = vpop.permute.xlu1 %1662 }
0x14b0   :  { %v1665_v50 = vmul.f32 %v2379_v35, %v1663_v36 }
0x14b2   :  { %1667 = vrot.lane.b32.xlu1 %v1665_v50, %s2571_s3 }
0x151f   :  { %v1603_v40 = vpop.permute.xlu0 %1602 }
0x1520   :  { %v1605_v41 = vadd.f32 %v1603_v40, %v1595_v38 }
0x1522   :  { %2380 = vtanh.f32 %v1605_v41 }
0x1524   :  { %v1668_v37 = vpop.permute.xlu1 %1667 }
0x1525   :  { %v1670_v43 = vadd.f32 %v1668_v37, %v1660_v42 }
0x1527   :  { %2382 = vtanh.f32 %v1670_v43 }
0x152c   :  { %v2381_v44 = vpop.eup %2380 }
0x152d   :  { %1608 = vrot.lane.b32.xlu0 %v2381_v44, %s2571_s3 }
0x1531   :  { %v2383_v39 = vpop.eup %2382 }
0x1532   :  { %1673 = vrot.lane.b32.xlu1 %v2383_v39, %s2571_s3 }
0x159f   :  { %v1609_v23 = vpop.permute.xlu0 %1608 }
0x15a0   :  { %v1611_v48 = vmul.f32 %v2377_v27, %v1609_v23 }
0x15a2   :  { %v1678_v51 = vpack.c.bf16 %v1611_v48, %v1611_v48 }
0x15a4   :  { %1680 = vrot.lane.b32.xlu0 %v1678_v51, %s2574_s26  ;;  %v1674_v52 = vpop.permute.xlu1 %1673 }
0x15a5   :  { %v1676_v53 = vmul.f32 %v2379_v35, %v1674_v52 }
0x15a7   :  { %v1677_v54 = vpack.c.bf16 %v1676_v53, %v1676_v53 }
0x15a9   :  { %1726 = vrot.lane.b32.xlu1 %v1677_v54, %s2574_s26 }
0x1616   :  { %v1681_v55 = vpop.permute.xlu0 %1680 }
0x1617   :  { %2198 = vmatmul.mubr.msk.bf16.vlgmr.msra.gmra.mrb[44].mxu1 %vm306_vm2, %v1681_v55 }
0x1618   :  { %2213 = vmatprep.mubr.msk.bf16.mxu1 %vm2573_vm1, %v2572_v46  ;;  %2210 = vmatpush3.bf16.msra.mxu1 %v2246_v14 }
0x1619   :  { %2211 = vmatprep.subr.bf16.mxu1 %v2572_v46 }
0x161b   :  { %v1727_v56 = vpop.permute.xlu1 %1726 }
0x161c   :  { %2206 = vmatmul.mubr.msk.bf16.vlgmr.msra.gmra.mrb[48].mxu0 %vm306_vm2, %v1727_v56  ;;  %2212 = vmatpush3.bf16.msra.mxu1 %v2247_v16 }
0x16ea   :  { %v1719_v58 = vpop.f32.mrb[44].mxu1 }
0x16eb   :  { %v2199_v60 = vpop.f32.mrb[45].mxu1 }
0x16ec   :  { %v1722_v61 = vpop.f32.mrb[46].mxu1 }
0x16ed   :  { %v2200_v62 = vpop.f32.mrb[47].mxu1 }
0x16ef   :  { %v1765_v63 = vpop.f32.mrb[48].mxu0 }
0x16f0   :  { %v1766_v0 = vadd.f32 %v1765_v63, %v1719_v58  ;;  %v2207_v29 = vpop.f32.mrb[49].mxu0 }
0x16f1   :  { %v1768_v1 = vpop.f32.mrb[50].mxu0 }
0x16f2   :  { %v1771_v4 = vadd.f32 %v2396_v3, %v1766_v0  ;;  %v2208_v5 = vpop.f32.mrb[51].mxu0 }
0x16f4   :  { %2384 = vtanh.f32 %v1771_v4  ;;  %v1934_v7 = vmul.f32 -1.442695, %v1771_v4 }
0x16f6   :  { %2386 = vpow2.f32 %v1934_v7 }
0x16fe   :  { %v2385_v6 = vpop.eup %2384 }
0x16ff   :  { %1781 = vrot.lane.b32.xlu0 %v2385_v6, %s2571_s3 }
0x1700   :  { %v2387_v8 = vpop.eup %2386 }
0x1701   :  { %v1775_v25 = vadd.f32 1.0, %v2387_v8 }
0x1703   :  { %2388 = vrcp.f32 %v1775_v25 }
0x170d   :  { %v2389_v9 = vpop.eup %2388 }
0x170e   :  { %v1779_v11 = vmul.f32 %v2389_v9, %v1605_v41 }
0x1771   :  { %v1782_v10 = vpop.permute.xlu0 %1781 }
0x1772   :  { %v1784_v57 = vmul.f32 %v2389_v9, %v1782_v10 }
0x1774   :  { %1786 = vrot.lane.b32.xlu1 %v1784_v57, %s2571_s3 }
0x17e6   :  { %v1787_v12 = vpop.permute.xlu1 %1786 }
0x17e7   :  { %v1789_v13 = vadd.f32 %v1787_v12, %v1779_v11 }
0x17e9   :  { %2390 = vtanh.f32 %v1789_v13 }
0x17f3   :  { %v2391_v15 = vpop.eup %2390 }
0x17f4   :  { %1792 = vrot.lane.b32.xlu0 %v2391_v15, %s2571_s3 }
0x1866   :  { %v1793_v59 = vpop.permute.xlu0 %1792 }
0x1867   :  { %v1795_v19 = vmul.f32 %v2389_v9, %v1793_v59 }
0x1869   :  { %v1800_v17 = vpack.c.bf16 %v1795_v19, %v1795_v19 }
0x186b   :  { %1802 = vrot.lane.b32.xlu1 %v1800_v17, %s2574_s26 }
0x18dd   :  { %v1803_v18 = vpop.permute.xlu1 %1802 }
0x18de   :  { %2214 = vmatmul.mubr.msk.bf16.vlgmr.msra.gmra.mrb[4].mxu1 %vm306_vm2, %v1803_v18 }
0x19b1   :  { %v1853_v21 = vpop.f32.mrb[4].mxu1 }
0x19b2   :  { %v2217_v46 = vadd.f32 %v1892_v20, %v1853_v21  ;;  %v2215_v45 = vpop.f32.mrb[5].mxu1 }
0x19b3   :  { %v1856_v47 = vpop.f32.mrb[6].mxu1 }
0x19b4   :  { %1859 = vst [vmem:[#allocation14] sm:$0xff] %v2217_v46  ;;  %v2216_v22 = vpop.f32.mrb[7].mxu1 }
0x19b5   :  { %2540 = shalt.err (!%p2537_p10)
}
0x19b6   :  { %s2541_s9 = scalar_lea.hbm %s3089_s10, 128 }
0x19b7   :  { %p2542_p11 = scmp.ne.s32.totalorder %s3089_s10, %s2541_s9  ;;  %p2545_p12 = scmp.lt.u32.totalorder %s2541_s9, %s3089_s10 }
0x19b9   :  { %p2547_p13 = pnand %p2545_p12, %p2542_p11 }
0x19bb   :  { %2550 = shalt.err (!%p2547_p13)
}
0x19bc   :  { %1869 = dma.vmem_to_hbm [thread:$0]  %s1867_s2, 128, %s3089_s10, [#allocation5]  }
0x19bd   :  { %2559 = dma.done.wait [#allocation5], 128  }
0x19be   :  { %2560 = vsyncadd [#allocation5], 4294967168 }
0x19bf   :  { %1873 = vsyncpa [#allocation4], 1 }
0x19c0   :  { %1874 = vsyncpa [#allocation7], 1 }
0x19c1   :  { %1875 = vsyncpa [#allocation10], 1 }
0x19c2   :  { %1876 = vsyncpa [#allocation13], 1 }
0x19c3   :  { %1877 = vsyncpa [#allocation5], 1 }

</bundles_post_ra>
